<compile_context>
chip_gen: v5e
topology: v5e:2x2
jax: 0.10.0
libtpu: 0.0.40
codegen_flags: <defaults>
</compile_context>

<pallas_src>
import numpy as np
import jax
import jax.numpy as jnp
from jax import lax
from jax.experimental import pallas as pl
from jax.experimental.pallas import tpu as pltpu


# ---------------------------------------------------------------------------
# Fused whole-network kernel (runs once per image; grid = batch).
# Per-image activation layout: rows = height, lanes = width*channels.
# ---------------------------------------------------------------------------
def _mynet_kernel(x_ref,
                  s1_ref, b1m_ref, eo1_ref, bt1_ref,
                  s2_ref, b2m_ref, eo2_ref, bt2_ref,
                  w1_ref, fb1_ref, w2_ref, fb2_ref, w3_ref, fb3_ref,
                  o_ref):
    f32, bf16 = jnp.float32, jnp.bfloat16
    x = x_ref[...]                                                   # (32,128), lane = iw*3+ci

    # ---- conv1 (5x5, 3->6) + ReLU + 2x2 max-pool, all as MXU matmuls ------
    y1 = jnp.zeros((28, 256), f32)                                   # lanes: even | odd conv cols
    for kh in range(5):
        rows = jnp.dot(s1_ref[kh], x, preferred_element_type=f32)   # (28,128) row-shifted input
        y1 = y1 + jnp.dot(rows.astype(bf16), b1m_ref[kh],
                          preferred_element_type=f32)                # banded conv matmul
    z1 = jnp.maximum(jnp.dot(eo1_ref[0], y1, preferred_element_type=f32),
                     jnp.dot(eo1_ref[1], y1, preferred_element_type=f32))  # pool rows
    p1 = jnp.maximum(z1[:, :128], z1[:, 128:])                       # pool cols (even|odd blocks)
    a1 = jnp.maximum(p1 + bt1_ref[...], 0.0)                         # (14,128), lane = pw*6+c

    # ---- conv2 (5x5, 6->16) + ReLU + 2x2 max-pool --------------------------
    y2 = jnp.zeros((10, 256), f32)
    for kh in range(5):
        rows = jnp.dot(s2_ref[kh], a1, preferred_element_type=f32)  # (10,128)
        y2 = y2 + jnp.dot(rows.astype(bf16), b2m_ref[kh],
                          preferred_element_type=f32)
    z2 = jnp.maximum(jnp.dot(eo2_ref[0], y2, preferred_element_type=f32),
                     jnp.dot(eo2_ref[1], y2, preferred_element_type=f32))  # (8,256)
    p2 = jnp.maximum(z2[:, :128], z2[:, 128:])
    a2 = jnp.maximum(p2 + bt2_ref[...], 0.0)                         # rows 0..4 valid, lane = w*16+c

    # ---- fc1 (torch.flatten folded into per-row weight blocks) + ReLU ------
    row_ids = lax.broadcasted_iota(jnp.int32, (8, 128), 0)
    acc = jnp.zeros((1, 128), f32)
    for h in range(5):
        rh = jnp.sum(jnp.where(row_ids == h, a2, 0.0), axis=0, keepdims=True)  # row h of a2
        acc = acc + jnp.dot(rh.astype(bf16), w1_ref[128 * h:128 * (h + 1), :],
                            preferred_element_type=f32)
    h1 = jnp.maximum(acc + fb1_ref[...], 0.0)                        # (1,128)

    # ---- fc2 + ReLU, fc3 ----------------------------------------------------
    h2 = jnp.maximum(jnp.dot(h1.astype(bf16), w2_ref[...],
                             preferred_element_type=f32) + fb2_ref[...], 0.0)
    o_ref[...] = jnp.dot(h2.astype(bf16), w3_ref[...],
                         preferred_element_type=f32) + fb3_ref[...]  # lanes 0..9 valid


# ---------------------------------------------------------------------------
# One-time offline parameter preparation (runs on host, outside the forward).
# ---------------------------------------------------------------------------
def prepare_params(p):
    c1w = np.asarray(p["conv1_w"], np.float32)   # (6, 3, 5, 5)  OIHW
    c1b = np.asarray(p["conv1_b"], np.float32)
    c2w = np.asarray(p["conv2_w"], np.float32)   # (16, 6, 5, 5)
    c2b = np.asarray(p["conv2_b"], np.float32)
    f1w = np.asarray(p["fc1_w"], np.float32)     # (400, 128)  (in, out)
    f1b = np.asarray(p["fc1_b"], np.float32)
    f2w = np.asarray(p["fc2_w"], np.float32)     # (128, 64)
    f2b = np.asarray(p["fc2_b"], np.float32)
    f3w = np.asarray(p["fc3_w"], np.float32)     # (64, 10)
    f3b = np.asarray(p["fc3_b"], np.float32)

    def banded(w, cin, cout, pw_out):
        # (5,128,256): for each kh, maps one input row (lane = iw*cin + ci) to the
        # even (lane e*cout+co, ow=2e) and odd (lane 128+e*cout+co, ow=2e+1) conv cols.
        b = np.zeros((5, 128, 256), np.float32)
        for kh in range(5):
            for kw in range(5):
                for ci in range(cin):
                    for co in range(cout):
                        v = w[co, ci, kh, kw]
                        for e in range(pw_out):
                            b[kh, (2 * e + kw) * cin + ci, e * cout + co] = v
                            b[kh, (2 * e + 1 + kw) * cin + ci, 128 + e * cout + co] = v
        return b

    def shift(rows_out, rows_in):
        s = np.zeros((5, rows_out, rows_in), np.float32)
        for kh in range(5):
            for oh in range(rows_out):
                s[kh, oh, oh + kh] = 1.0
        return s

    def pool_rows(p_out, rows_in, pad_rows=None):
        r = p_out if pad_rows is None else pad_rows
        eo = np.zeros((2, r, rows_in), np.float32)
        for pr in range(p_out):
            eo[0, pr, 2 * pr] = 1.0
            eo[1, pr, 2 * pr + 1] = 1.0
        return eo

    b1m = banded(c1w, 3, 6, 14)
    s1 = shift(28, 32)
    eo1 = pool_rows(14, 28)
    bt1 = np.zeros((1, 128), np.float32)
    for w in range(14):
        bt1[0, w * 6:w * 6 + 6] = c1b

    b2m = banded(c2w, 6, 16, 5)
    s2 = shift(10, 14)
    eo2 = pool_rows(5, 10, pad_rows=8)
    bt2 = np.zeros((1, 128), np.float32)
    for w in range(5):
        bt2[0, w * 16:w * 16 + 16] = c2b

    # Fold torch.flatten's (c, h, w) order into fc1: block h holds rows indexed by w*16+c.
    f1wp = np.zeros((5 * 128, 128), np.float32)
    for h in range(5):
        for w in range(5):
            for c in range(16):
                f1wp[128 * h + w * 16 + c, :] = f1w[c * 25 + h * 5 + w, :]
    fb1 = f1b.reshape(1, 128)

    f2wp = np.zeros((128, 128), np.float32); f2wp[:, :64] = f2w
    fb2 = np.zeros((1, 128), np.float32);    fb2[0, :64] = f2b
    f3wp = np.zeros((128, 128), np.float32); f3wp[:64, :10] = f3w
    fb3 = np.zeros((1, 128), np.float32);    fb3[0, :10] = f3b

    bf = jnp.bfloat16
    return {
        "s1": jnp.asarray(s1), "b1m": jnp.asarray(b1m, bf),
        "eo1": jnp.asarray(eo1), "bt1": jnp.asarray(bt1),
        "s2": jnp.asarray(s2), "b2m": jnp.asarray(b2m, bf),
        "eo2": jnp.asarray(eo2), "bt2": jnp.asarray(bt2),
        "fc1w": jnp.asarray(f1wp, bf), "fb1": jnp.asarray(fb1),
        "fc2w": jnp.asarray(f2wp, bf), "fb2": jnp.asarray(fb2),
        "fc3w": jnp.asarray(f3wp, bf), "fb3": jnp.asarray(fb3),
    }


# ---------------------------------------------------------------------------
# Forward pass: one fused pallas_call, grid over batch ("parallel").
# ---------------------------------------------------------------------------
@jax.jit
def mynet_forward(x_nchw, prep):
    n, c, h, w = x_nchw.shape
    assert (c, h, w) == (3, 32, 32), "MyNet expects 3x32x32 inputs (fc1 is 400-wide)"
    x = jnp.transpose(x_nchw.astype(jnp.float32), (0, 2, 3, 1)).reshape(n, 32, 96)
    x = jnp.pad(x, ((0, 0), (0, 0), (0, 32)))            # lane-pad W*C: 96 -> 128

    out = pl.pallas_call(
        _mynet_kernel,
        out_shape=jax.ShapeDtypeStruct((n, 1, 128), jnp.float32),
        grid_spec=pltpu.PrefetchScalarGridSpec(
            num_scalar_prefetch=0,
            grid=(n,),
            in_specs=[
                pl.BlockSpec((None, 32, 128), lambda i: (i, 0, 0)),   # image i
                pl.BlockSpec((5, 28, 32), lambda i: (0, 0, 0)),       # s1
                pl.BlockSpec((5, 128, 256), lambda i: (0, 0, 0)),     # b1m
                pl.BlockSpec((2, 14, 28), lambda i: (0, 0, 0)),       # eo1
                pl.BlockSpec((1, 128), lambda i: (0, 0)),             # bt1
                pl.BlockSpec((5, 10, 14), lambda i: (0, 0, 0)),       # s2
                pl.BlockSpec((5, 128, 256), lambda i: (0, 0, 0)),     # b2m
                pl.BlockSpec((2, 8, 10), lambda i: (0, 0, 0)),        # eo2
                pl.BlockSpec((1, 128), lambda i: (0, 0)),             # bt2
                pl.BlockSpec((640, 128), lambda i: (0, 0)),           # fc1w
                pl.BlockSpec((1, 128), lambda i: (0, 0)),             # fb1
                pl.BlockSpec((128, 128), lambda i: (0, 0)),           # fc2w
                pl.BlockSpec((1, 128), lambda i: (0, 0)),             # fb2
                pl.BlockSpec((128, 128), lambda i: (0, 0)),           # fc3w
                pl.BlockSpec((1, 128), lambda i: (0, 0)),             # fb3
            ],
            out_specs=pl.BlockSpec((None, 1, 128), lambda i: (i, 0, 0)),
        ),
        compiler_params=pltpu.CompilerParams(
            dimension_semantics=("parallel",)),
    )(x, prep["s1"], prep["b1m"], prep["eo1"], prep["bt1"],
      prep["s2"], prep["b2m"], prep["eo2"], prep["bt2"],
      prep["fc1w"], prep["fb1"], prep["fc2w"], prep["fb2"],
      prep["fc3w"], prep["fb3"])
    return out.reshape(n, 128)[:, :10]


# Pure-JAX (XLA) reference of the same module, used only as a correctness check.
def reference_forward(x, params):
    def conv_block(h, w, b):
        h = lax.conv_general_dilated(
            h, w, window_strides=(1, 1), padding="VALID",
            dimension_numbers=("NCHW", "OIHW", "NCHW"))
        h = jnp.maximum(h + b[None, :, None, None], 0.0)
        return lax.reduce_window(h, -jnp.inf, lax.max,
                                 (1, 1, 2, 2), (1, 1, 2, 2), "VALID")

    h = conv_block(x, params["conv1_w"], params["conv1_b"])
    h = conv_block(h, params["conv2_w"], params["conv2_b"])
    h = h.reshape(h.shape[0], -1)
    h = jnp.maximum(h @ params["fc1_w"] + params["fc1_b"], 0.0)
    h = jnp.maximum(h @ params["fc2_w"] + params["fc2_b"], 0.0)
    return h @ params["fc3_w"] + params["fc3_b"]


if __name__ == "__main__":
    keys = jax.random.split(jax.random.PRNGKey(0), 12)
    # MyNet implies 3 input channels and 32x32 spatial (fc1 expects 16*5*5 = 400).
    x = jax.random.normal(keys[0], (2, 3, 32, 32), dtype=jnp.float32)
    params = {
        "conv1_w": 0.10 * jax.random.normal(keys[1], (6, 3, 5, 5), jnp.float32),
        "conv1_b": 0.10 * jax.random.normal(keys[2], (6,), jnp.float32),
        "conv2_w": 0.10 * jax.random.normal(keys[3], (16, 6, 5, 5), jnp.float32),
        "conv2_b": 0.10 * jax.random.normal(keys[4], (16,), jnp.float32),
        "fc1_w": 0.05 * jax.random.normal(keys[5], (400, 128), jnp.float32),
        "fc1_b": 0.05 * jax.random.normal(keys[6], (128,), jnp.float32),
        "fc2_w": 0.05 * jax.random.normal(keys[7], (128, 64), jnp.float32),
        "fc2_b": 0.05 * jax.random.normal(keys[8], (64,), jnp.float32),
        "fc3_w": 0.05 * jax.random.normal(keys[9], (64, 10), jnp.float32),
        "fc3_b": 0.05 * jax.random.normal(keys[10], (10,), jnp.float32),
    }

    prep = prepare_params(params)          # one-time offline weight preparation
    out = mynet_forward(x, prep)
    jax.block_until_ready(out)
    assert out.shape == (2, 10) and out.dtype == jnp.float32

    ref = reference_forward(x, params)
    max_err = float(jnp.max(jnp.abs(out - ref)))
    assert max_err < 5e-2, f"mismatch vs reference: max abs err = {max_err}"
    print("KERNEL_OK")
</pallas_src>

<mosaic_0001>
module attributes {stable_mosaic.version = 11 : i64} {
  func.func @_mynet_kernel(%arg0: i32, %arg1: memref<1x32x128xf32, #tpu.memory_space<vmem>>, %arg2: memref<5x28x32xf32, #tpu.memory_space<vmem>>, %arg3: memref<5x128x256xbf16, #tpu.memory_space<vmem>>, %arg4: memref<2x14x28xf32, #tpu.memory_space<vmem>>, %arg5: memref<1x128xf32, #tpu.memory_space<vmem>>, %arg6: memref<5x10x14xf32, #tpu.memory_space<vmem>>, %arg7: memref<5x128x256xbf16, #tpu.memory_space<vmem>>, %arg8: memref<2x8x10xf32, #tpu.memory_space<vmem>>, %arg9: memref<1x128xf32, #tpu.memory_space<vmem>>, %arg10: memref<640x128xbf16, #tpu.memory_space<vmem>>, %arg11: memref<1x128xf32, #tpu.memory_space<vmem>>, %arg12: memref<128x128xbf16, #tpu.memory_space<vmem>>, %arg13: memref<1x128xf32, #tpu.memory_space<vmem>>, %arg14: memref<128x128xbf16, #tpu.memory_space<vmem>>, %arg15: memref<1x128xf32, #tpu.memory_space<vmem>>, %arg16: memref<1x1x128xf32, #tpu.memory_space<vmem>>) attributes {dimension_semantics = [#tpu.dimension_semantics<parallel>], iteration_bounds = array<i64: 2>, scalar_prefetch = 0 : i64, scratch_operands = 0 : i64, tpu.core_type = #tpu.core_type<tc>, window_params = [{transform_indices = @transform_0, window_bounds = array<i64: 1, 32, 128>}, {pipeline_mode = #tpu.pipeline_mode<synchronous>, transform_indices = @transform_1, window_bounds = array<i64: 5, 28, 32>}, {pipeline_mode = #tpu.pipeline_mode<synchronous>, transform_indices = @transform_2, window_bounds = array<i64: 5, 128, 256>}, {pipeline_mode = #tpu.pipeline_mode<synchronous>, transform_indices = @transform_3, window_bounds = array<i64: 2, 14, 28>}, {pipeline_mode = #tpu.pipeline_mode<synchronous>, transform_indices = @transform_4, window_bounds = array<i64: 1, 128>}, {pipeline_mode = #tpu.pipeline_mode<synchronous>, transform_indices = @transform_5, window_bounds = array<i64: 5, 10, 14>}, {pipeline_mode = #tpu.pipeline_mode<synchronous>, transform_indices = @transform_6, window_bounds = array<i64: 5, 128, 256>}, {pipeline_mode = #tpu.pipeline_mode<synchronous>, transform_indices = @transform_7, window_bounds = array<i64: 2, 8, 10>}, {pipeline_mode = #tpu.pipeline_mode<synchronous>, transform_indices = @transform_8, window_bounds = array<i64: 1, 128>}, {pipeline_mode = #tpu.pipeline_mode<synchronous>, transform_indices = @transform_9, window_bounds = array<i64: 640, 128>}, {pipeline_mode = #tpu.pipeline_mode<synchronous>, transform_indices = @transform_10, window_bounds = array<i64: 1, 128>}, {pipeline_mode = #tpu.pipeline_mode<synchronous>, transform_indices = @transform_11, window_bounds = array<i64: 128, 128>}, {pipeline_mode = #tpu.pipeline_mode<synchronous>, transform_indices = @transform_12, window_bounds = array<i64: 1, 128>}, {pipeline_mode = #tpu.pipeline_mode<synchronous>, transform_indices = @transform_13, window_bounds = array<i64: 128, 128>}, {pipeline_mode = #tpu.pipeline_mode<synchronous>, transform_indices = @transform_14, window_bounds = array<i64: 1, 128>}, {transform_indices = @transform_15, window_bounds = array<i64: 1, 1, 128>}]} {
    %c0 = arith.constant 0 : index
    %c0_0 = arith.constant 0 : index
    %c0_1 = arith.constant 0 : index
    %0 = vector.load %arg1[%c0, %c0_0, %c0_1] : memref<1x32x128xf32, #tpu.memory_space<vmem>>, vector<1x32x128xf32>
    %1 = vector.shape_cast %0 : vector<1x32x128xf32> to vector<32x128xf32>
    %cst = arith.constant 0.000000e+00 : f32
    %2 = vector.broadcast %cst : f32 to vector<28x256xf32>
    %c0_2 = arith.constant 0 : index
    %c0_3 = arith.constant 0 : index
    %c0_4 = arith.constant 0 : index
    %3 = vector.load %arg2[%c0_2, %c0_3, %c0_4] : memref<5x28x32xf32, #tpu.memory_space<vmem>>, vector<1x28x32xf32>
    %4 = vector.shape_cast %3 : vector<1x28x32xf32> to vector<28x32xf32>
    %cst_5 = arith.constant dense<0.000000e+00> : vector<28x128xf32>
    %5 = tpu.matmul %4, %1, %cst_5 {dimension_numbers = #tpu.dot_dimension_numbers<[1], [0], [0], [1], [0, 0, 1, 1], [], []>} : vector<28x32xf32>, vector<32x128xf32>, vector<28x128xf32> -> vector<28x128xf32>
    %6 = arith.truncf %5 : vector<28x128xf32> to vector<28x128xbf16>
    %c0_6 = arith.constant 0 : index
    %c0_7 = arith.constant 0 : index
    %c0_8 = arith.constant 0 : index
    %7 = vector.load %arg3[%c0_6, %c0_7, %c0_8] : memref<5x128x256xbf16, #tpu.memory_space<vmem>>, vector<1x128x256xbf16>
    %8 = vector.shape_cast %7 : vector<1x128x256xbf16> to vector<128x256xbf16>
    %cst_9 = arith.constant dense<0.000000e+00> : vector<28x256xf32>
    %9 = tpu.matmul %6, %8, %cst_9 {dimension_numbers = #tpu.dot_dimension_numbers<[1], [0], [0], [1], [0, 0, 1, 1], [], []>} : vector<28x128xbf16>, vector<128x256xbf16>, vector<28x256xf32> -> vector<28x256xf32>
    %10 = arith.addf %2, %9 : vector<28x256xf32>
    %c1 = arith.constant 1 : index
    %c0_10 = arith.constant 0 : index
    %c0_11 = arith.constant 0 : index
    %11 = vector.load %arg2[%c1, %c0_10, %c0_11] : memref<5x28x32xf32, #tpu.memory_space<vmem>>, vector<1x28x32xf32>
    %12 = vector.shape_cast %11 : vector<1x28x32xf32> to vector<28x32xf32>
    %cst_12 = arith.constant dense<0.000000e+00> : vector<28x128xf32>
    %13 = tpu.matmul %12, %1, %cst_12 {dimension_numbers = #tpu.dot_dimension_numbers<[1], [0], [0], [1], [0, 0, 1, 1], [], []>} : vector<28x32xf32>, vector<32x128xf32>, vector<28x128xf32> -> vector<28x128xf32>
    %14 = arith.truncf %13 : vector<28x128xf32> to vector<28x128xbf16>
    %c1_13 = arith.constant 1 : index
    %c0_14 = arith.constant 0 : index
    %c0_15 = arith.constant 0 : index
    %15 = vector.load %arg3[%c1_13, %c0_14, %c0_15] : memref<5x128x256xbf16, #tpu.memory_space<vmem>>, vector<1x128x256xbf16>
    %16 = vector.shape_cast %15 : vector<1x128x256xbf16> to vector<128x256xbf16>
    %cst_16 = arith.constant dense<0.000000e+00> : vector<28x256xf32>
    %17 = tpu.matmul %14, %16, %cst_16 {dimension_numbers = #tpu.dot_dimension_numbers<[1], [0], [0], [1], [0, 0, 1, 1], [], []>} : vector<28x128xbf16>, vector<128x256xbf16>, vector<28x256xf32> -> vector<28x256xf32>
    %18 = arith.addf %10, %17 : vector<28x256xf32>
    %c2 = arith.constant 2 : index
    %c0_17 = arith.constant 0 : index
    %c0_18 = arith.constant 0 : index
    %19 = vector.load %arg2[%c2, %c0_17, %c0_18] : memref<5x28x32xf32, #tpu.memory_space<vmem>>, vector<1x28x32xf32>
    %20 = vector.shape_cast %19 : vector<1x28x32xf32> to vector<28x32xf32>
    %cst_19 = arith.constant dense<0.000000e+00> : vector<28x128xf32>
    %21 = tpu.matmul %20, %1, %cst_19 {dimension_numbers = #tpu.dot_dimension_numbers<[1], [0], [0], [1], [0, 0, 1, 1], [], []>} : vector<28x32xf32>, vector<32x128xf32>, vector<28x128xf32> -> vector<28x128xf32>
    %22 = arith.truncf %21 : vector<28x128xf32> to vector<28x128xbf16>
    %c2_20 = arith.constant 2 : index
    %c0_21 = arith.constant 0 : index
    %c0_22 = arith.constant 0 : index
    %23 = vector.load %arg3[%c2_20, %c0_21, %c0_22] : memref<5x128x256xbf16, #tpu.memory_space<vmem>>, vector<1x128x256xbf16>
    %24 = vector.shape_cast %23 : vector<1x128x256xbf16> to vector<128x256xbf16>
    %cst_23 = arith.constant dense<0.000000e+00> : vector<28x256xf32>
    %25 = tpu.matmul %22, %24, %cst_23 {dimension_numbers = #tpu.dot_dimension_numbers<[1], [0], [0], [1], [0, 0, 1, 1], [], []>} : vector<28x128xbf16>, vector<128x256xbf16>, vector<28x256xf32> -> vector<28x256xf32>
    %26 = arith.addf %18, %25 : vector<28x256xf32>
    %c3 = arith.constant 3 : index
    %c0_24 = arith.constant 0 : index
    %c0_25 = arith.constant 0 : index
    %27 = vector.load %arg2[%c3, %c0_24, %c0_25] : memref<5x28x32xf32, #tpu.memory_space<vmem>>, vector<1x28x32xf32>
    %28 = vector.shape_cast %27 : vector<1x28x32xf32> to vector<28x32xf32>
    %cst_26 = arith.constant dense<0.000000e+00> : vector<28x128xf32>
    %29 = tpu.matmul %28, %1, %cst_26 {dimension_numbers = #tpu.dot_dimension_numbers<[1], [0], [0], [1], [0, 0, 1, 1], [], []>} : vector<28x32xf32>, vector<32x128xf32>, vector<28x128xf32> -> vector<28x128xf32>
    %30 = arith.truncf %29 : vector<28x128xf32> to vector<28x128xbf16>
    %c3_27 = arith.constant 3 : index
    %c0_28 = arith.constant 0 : index
    %c0_29 = arith.constant 0 : index
    %31 = vector.load %arg3[%c3_27, %c0_28, %c0_29] : memref<5x128x256xbf16, #tpu.memory_space<vmem>>, vector<1x128x256xbf16>
    %32 = vector.shape_cast %31 : vector<1x128x256xbf16> to vector<128x256xbf16>
    %cst_30 = arith.constant dense<0.000000e+00> : vector<28x256xf32>
    %33 = tpu.matmul %30, %32, %cst_30 {dimension_numbers = #tpu.dot_dimension_numbers<[1], [0], [0], [1], [0, 0, 1, 1], [], []>} : vector<28x128xbf16>, vector<128x256xbf16>, vector<28x256xf32> -> vector<28x256xf32>
    %34 = arith.addf %26, %33 : vector<28x256xf32>
    %c4 = arith.constant 4 : index
    %c0_31 = arith.constant 0 : index
    %c0_32 = arith.constant 0 : index
    %35 = vector.load %arg2[%c4, %c0_31, %c0_32] : memref<5x28x32xf32, #tpu.memory_space<vmem>>, vector<1x28x32xf32>
    %36 = vector.shape_cast %35 : vector<1x28x32xf32> to vector<28x32xf32>
    %cst_33 = arith.constant dense<0.000000e+00> : vector<28x128xf32>
    %37 = tpu.matmul %36, %1, %cst_33 {dimension_numbers = #tpu.dot_dimension_numbers<[1], [0], [0], [1], [0, 0, 1, 1], [], []>} : vector<28x32xf32>, vector<32x128xf32>, vector<28x128xf32> -> vector<28x128xf32>
    %38 = arith.truncf %37 : vector<28x128xf32> to vector<28x128xbf16>
    %c4_34 = arith.constant 4 : index
    %c0_35 = arith.constant 0 : index
    %c0_36 = arith.constant 0 : index
    %39 = vector.load %arg3[%c4_34, %c0_35, %c0_36] : memref<5x128x256xbf16, #tpu.memory_space<vmem>>, vector<1x128x256xbf16>
    %40 = vector.shape_cast %39 : vector<1x128x256xbf16> to vector<128x256xbf16>
    %cst_37 = arith.constant dense<0.000000e+00> : vector<28x256xf32>
    %41 = tpu.matmul %38, %40, %cst_37 {dimension_numbers = #tpu.dot_dimension_numbers<[1], [0], [0], [1], [0, 0, 1, 1], [], []>} : vector<28x128xbf16>, vector<128x256xbf16>, vector<28x256xf32> -> vector<28x256xf32>
    %42 = arith.addf %34, %41 : vector<28x256xf32>
    %c0_38 = arith.constant 0 : index
    %c0_39 = arith.constant 0 : index
    %c0_40 = arith.constant 0 : index
    %43 = vector.load %arg4[%c0_38, %c0_39, %c0_40] : memref<2x14x28xf32, #tpu.memory_space<vmem>>, vector<1x14x28xf32>
    %44 = vector.shape_cast %43 : vector<1x14x28xf32> to vector<14x28xf32>
    %cst_41 = arith.constant dense<0.000000e+00> : vector<14x256xf32>
    %45 = tpu.matmul %44, %42, %cst_41 {dimension_numbers = #tpu.dot_dimension_numbers<[1], [0], [0], [1], [0, 0, 1, 1], [], []>} : vector<14x28xf32>, vector<28x256xf32>, vector<14x256xf32> -> vector<14x256xf32>
    %c1_42 = arith.constant 1 : index
    %c0_43 = arith.constant 0 : index
    %c0_44 = arith.constant 0 : index
    %46 = vector.load %arg4[%c1_42, %c0_43, %c0_44] : memref<2x14x28xf32, #tpu.memory_space<vmem>>, vector<1x14x28xf32>
    %47 = vector.shape_cast %46 : vector<1x14x28xf32> to vector<14x28xf32>
    %cst_45 = arith.constant dense<0.000000e+00> : vector<14x256xf32>
    %48 = tpu.matmul %47, %42, %cst_45 {dimension_numbers = #tpu.dot_dimension_numbers<[1], [0], [0], [1], [0, 0, 1, 1], [], []>} : vector<14x28xf32>, vector<28x256xf32>, vector<14x256xf32> -> vector<14x256xf32>
    %49 = arith.maximumf %45, %48 : vector<14x256xf32>
    %50 = vector.extract_strided_slice %49 {offsets = [0, 0], sizes = [14, 128], strides = [1, 1]} : vector<14x256xf32> to vector<14x128xf32>
    %51 = vector.extract_strided_slice %49 {offsets = [0, 128], sizes = [14, 128], strides = [1, 1]} : vector<14x256xf32> to vector<14x128xf32>
    %52 = arith.maximumf %50, %51 : vector<14x128xf32>
    %c0_46 = arith.constant 0 : index
    %c0_47 = arith.constant 0 : index
    %53 = vector.load %arg5[%c0_46, %c0_47] : memref<1x128xf32, #tpu.memory_space<vmem>>, vector<1x128xf32>
    %54 = vector.broadcast %53 : vector<1x128xf32> to vector<14x128xf32>
    %55 = arith.addf %52, %54 : vector<14x128xf32>
    %cst_48 = arith.constant 0.000000e+00 : f32
    %56 = vector.broadcast %cst_48 : f32 to vector<14x128xf32>
    %57 = arith.maximumf %55, %56 : vector<14x128xf32>
    %cst_49 = arith.constant 0.000000e+00 : f32
    %58 = vector.broadcast %cst_49 : f32 to vector<10x256xf32>
    %c0_50 = arith.constant 0 : index
    %c0_51 = arith.constant 0 : index
    %c0_52 = arith.constant 0 : index
    %59 = vector.load %arg6[%c0_50, %c0_51, %c0_52] : memref<5x10x14xf32, #tpu.memory_space<vmem>>, vector<1x10x14xf32>
    %60 = vector.shape_cast %59 : vector<1x10x14xf32> to vector<10x14xf32>
    %cst_53 = arith.constant dense<0.000000e+00> : vector<10x128xf32>
    %61 = tpu.matmul %60, %57, %cst_53 {dimension_numbers = #tpu.dot_dimension_numbers<[1], [0], [0], [1], [0, 0, 1, 1], [], []>} : vector<10x14xf32>, vector<14x128xf32>, vector<10x128xf32> -> vector<10x128xf32>
    %62 = arith.truncf %61 : vector<10x128xf32> to vector<10x128xbf16>
    %c0_54 = arith.constant 0 : index
    %c0_55 = arith.constant 0 : index
    %c0_56 = arith.constant 0 : index
    %63 = vector.load %arg7[%c0_54, %c0_55, %c0_56] : memref<5x128x256xbf16, #tpu.memory_space<vmem>>, vector<1x128x256xbf16>
    %64 = vector.shape_cast %63 : vector<1x128x256xbf16> to vector<128x256xbf16>
    %cst_57 = arith.constant dense<0.000000e+00> : vector<10x256xf32>
    %65 = tpu.matmul %62, %64, %cst_57 {dimension_numbers = #tpu.dot_dimension_numbers<[1], [0], [0], [1], [0, 0, 1, 1], [], []>} : vector<10x128xbf16>, vector<128x256xbf16>, vector<10x256xf32> -> vector<10x256xf32>
    %66 = arith.addf %58, %65 : vector<10x256xf32>
    %c1_58 = arith.constant 1 : index
    %c0_59 = arith.constant 0 : index
    %c0_60 = arith.constant 0 : index
    %67 = vector.load %arg6[%c1_58, %c0_59, %c0_60] : memref<5x10x14xf32, #tpu.memory_space<vmem>>, vector<1x10x14xf32>
    %68 = vector.shape_cast %67 : vector<1x10x14xf32> to vector<10x14xf32>
    %cst_61 = arith.constant dense<0.000000e+00> : vector<10x128xf32>
    %69 = tpu.matmul %68, %57, %cst_61 {dimension_numbers = #tpu.dot_dimension_numbers<[1], [0], [0], [1], [0, 0, 1, 1], [], []>} : vector<10x14xf32>, vector<14x128xf32>, vector<10x128xf32> -> vector<10x128xf32>
    %70 = arith.truncf %69 : vector<10x128xf32> to vector<10x128xbf16>
    %c1_62 = arith.constant 1 : index
    %c0_63 = arith.constant 0 : index
    %c0_64 = arith.constant 0 : index
    %71 = vector.load %arg7[%c1_62, %c0_63, %c0_64] : memref<5x128x256xbf16, #tpu.memory_space<vmem>>, vector<1x128x256xbf16>
    %72 = vector.shape_cast %71 : vector<1x128x256xbf16> to vector<128x256xbf16>
    %cst_65 = arith.constant dense<0.000000e+00> : vector<10x256xf32>
    %73 = tpu.matmul %70, %72, %cst_65 {dimension_numbers = #tpu.dot_dimension_numbers<[1], [0], [0], [1], [0, 0, 1, 1], [], []>} : vector<10x128xbf16>, vector<128x256xbf16>, vector<10x256xf32> -> vector<10x256xf32>
    %74 = arith.addf %66, %73 : vector<10x256xf32>
    %c2_66 = arith.constant 2 : index
    %c0_67 = arith.constant 0 : index
    %c0_68 = arith.constant 0 : index
    %75 = vector.load %arg6[%c2_66, %c0_67, %c0_68] : memref<5x10x14xf32, #tpu.memory_space<vmem>>, vector<1x10x14xf32>
    %76 = vector.shape_cast %75 : vector<1x10x14xf32> to vector<10x14xf32>
    %cst_69 = arith.constant dense<0.000000e+00> : vector<10x128xf32>
    %77 = tpu.matmul %76, %57, %cst_69 {dimension_numbers = #tpu.dot_dimension_numbers<[1], [0], [0], [1], [0, 0, 1, 1], [], []>} : vector<10x14xf32>, vector<14x128xf32>, vector<10x128xf32> -> vector<10x128xf32>
    %78 = arith.truncf %77 : vector<10x128xf32> to vector<10x128xbf16>
    %c2_70 = arith.constant 2 : index
    %c0_71 = arith.constant 0 : index
    %c0_72 = arith.constant 0 : index
    %79 = vector.load %arg7[%c2_70, %c0_71, %c0_72] : memref<5x128x256xbf16, #tpu.memory_space<vmem>>, vector<1x128x256xbf16>
    %80 = vector.shape_cast %79 : vector<1x128x256xbf16> to vector<128x256xbf16>
    %cst_73 = arith.constant dense<0.000000e+00> : vector<10x256xf32>
    %81 = tpu.matmul %78, %80, %cst_73 {dimension_numbers = #tpu.dot_dimension_numbers<[1], [0], [0], [1], [0, 0, 1, 1], [], []>} : vector<10x128xbf16>, vector<128x256xbf16>, vector<10x256xf32> -> vector<10x256xf32>
    %82 = arith.addf %74, %81 : vector<10x256xf32>
    %c3_74 = arith.constant 3 : index
    %c0_75 = arith.constant 0 : index
    %c0_76 = arith.constant 0 : index
    %83 = vector.load %arg6[%c3_74, %c0_75, %c0_76] : memref<5x10x14xf32, #tpu.memory_space<vmem>>, vector<1x10x14xf32>
    %84 = vector.shape_cast %83 : vector<1x10x14xf32> to vector<10x14xf32>
    %cst_77 = arith.constant dense<0.000000e+00> : vector<10x128xf32>
    %85 = tpu.matmul %84, %57, %cst_77 {dimension_numbers = #tpu.dot_dimension_numbers<[1], [0], [0], [1], [0, 0, 1, 1], [], []>} : vector<10x14xf32>, vector<14x128xf32>, vector<10x128xf32> -> vector<10x128xf32>
    %86 = arith.truncf %85 : vector<10x128xf32> to vector<10x128xbf16>
    %c3_78 = arith.constant 3 : index
    %c0_79 = arith.constant 0 : index
    %c0_80 = arith.constant 0 : index
    %87 = vector.load %arg7[%c3_78, %c0_79, %c0_80] : memref<5x128x256xbf16, #tpu.memory_space<vmem>>, vector<1x128x256xbf16>
    %88 = vector.shape_cast %87 : vector<1x128x256xbf16> to vector<128x256xbf16>
    %cst_81 = arith.constant dense<0.000000e+00> : vector<10x256xf32>
    %89 = tpu.matmul %86, %88, %cst_81 {dimension_numbers = #tpu.dot_dimension_numbers<[1], [0], [0], [1], [0, 0, 1, 1], [], []>} : vector<10x128xbf16>, vector<128x256xbf16>, vector<10x256xf32> -> vector<10x256xf32>
    %90 = arith.addf %82, %89 : vector<10x256xf32>
    %c4_82 = arith.constant 4 : index
    %c0_83 = arith.constant 0 : index
    %c0_84 = arith.constant 0 : index
    %91 = vector.load %arg6[%c4_82, %c0_83, %c0_84] : memref<5x10x14xf32, #tpu.memory_space<vmem>>, vector<1x10x14xf32>
    %92 = vector.shape_cast %91 : vector<1x10x14xf32> to vector<10x14xf32>
    %cst_85 = arith.constant dense<0.000000e+00> : vector<10x128xf32>
    %93 = tpu.matmul %92, %57, %cst_85 {dimension_numbers = #tpu.dot_dimension_numbers<[1], [0], [0], [1], [0, 0, 1, 1], [], []>} : vector<10x14xf32>, vector<14x128xf32>, vector<10x128xf32> -> vector<10x128xf32>
    %94 = arith.truncf %93 : vector<10x128xf32> to vector<10x128xbf16>
    %c4_86 = arith.constant 4 : index
    %c0_87 = arith.constant 0 : index
    %c0_88 = arith.constant 0 : index
    %95 = vector.load %arg7[%c4_86, %c0_87, %c0_88] : memref<5x128x256xbf16, #tpu.memory_space<vmem>>, vector<1x128x256xbf16>
    %96 = vector.shape_cast %95 : vector<1x128x256xbf16> to vector<128x256xbf16>
    %cst_89 = arith.constant dense<0.000000e+00> : vector<10x256xf32>
    %97 = tpu.matmul %94, %96, %cst_89 {dimension_numbers = #tpu.dot_dimension_numbers<[1], [0], [0], [1], [0, 0, 1, 1], [], []>} : vector<10x128xbf16>, vector<128x256xbf16>, vector<10x256xf32> -> vector<10x256xf32>
    %98 = arith.addf %90, %97 : vector<10x256xf32>
    %c0_90 = arith.constant 0 : index
    %c0_91 = arith.constant 0 : index
    %c0_92 = arith.constant 0 : index
    %99 = vector.load %arg8[%c0_90, %c0_91, %c0_92] : memref<2x8x10xf32, #tpu.memory_space<vmem>>, vector<1x8x10xf32>
    %100 = vector.shape_cast %99 : vector<1x8x10xf32> to vector<8x10xf32>
    %cst_93 = arith.constant dense<0.000000e+00> : vector<8x256xf32>
    %101 = tpu.matmul %100, %98, %cst_93 {dimension_numbers = #tpu.dot_dimension_numbers<[1], [0], [0], [1], [0, 0, 1, 1], [], []>} : vector<8x10xf32>, vector<10x256xf32>, vector<8x256xf32> -> vector<8x256xf32>
    %c1_94 = arith.constant 1 : index
    %c0_95 = arith.constant 0 : index
    %c0_96 = arith.constant 0 : index
    %102 = vector.load %arg8[%c1_94, %c0_95, %c0_96] : memref<2x8x10xf32, #tpu.memory_space<vmem>>, vector<1x8x10xf32>
    %103 = vector.shape_cast %102 : vector<1x8x10xf32> to vector<8x10xf32>
    %cst_97 = arith.constant dense<0.000000e+00> : vector<8x256xf32>
    %104 = tpu.matmul %103, %98, %cst_97 {dimension_numbers = #tpu.dot_dimension_numbers<[1], [0], [0], [1], [0, 0, 1, 1], [], []>} : vector<8x10xf32>, vector<10x256xf32>, vector<8x256xf32> -> vector<8x256xf32>
    %105 = arith.maximumf %101, %104 : vector<8x256xf32>
    %106 = vector.extract_strided_slice %105 {offsets = [0, 0], sizes = [8, 128], strides = [1, 1]} : vector<8x256xf32> to vector<8x128xf32>
    %107 = vector.extract_strided_slice %105 {offsets = [0, 128], sizes = [8, 128], strides = [1, 1]} : vector<8x256xf32> to vector<8x128xf32>
    %108 = arith.maximumf %106, %107 : vector<8x128xf32>
    %c0_98 = arith.constant 0 : index
    %c0_99 = arith.constant 0 : index
    %109 = vector.load %arg9[%c0_98, %c0_99] : memref<1x128xf32, #tpu.memory_space<vmem>>, vector<1x128xf32>
    %110 = vector.broadcast %109 : vector<1x128xf32> to vector<8x128xf32>
    %111 = arith.addf %108, %110 : vector<8x128xf32>
    %cst_100 = arith.constant 0.000000e+00 : f32
    %112 = vector.broadcast %cst_100 : f32 to vector<8x128xf32>
    %113 = arith.maximumf %111, %112 : vector<8x128xf32>
    %114 = tpu.iota {dimensions = array<i32: 0>} : vector<8x128xi32>
    %cst_101 = arith.constant 0.000000e+00 : f32
    %115 = vector.broadcast %cst_101 : f32 to vector<1x128xf32>
    %c0_i32 = arith.constant 0 : i32
    %116 = vector.broadcast %c0_i32 : i32 to vector<8x128xi32>
    %117 = arith.cmpi eq, %114, %116 : vector<8x128xi32>
    %cst_102 = arith.constant 0.000000e+00 : f32
    %118 = vector.broadcast %cst_102 : f32 to vector<8x128xf32>
    %119 = arith.select %117, %113, %118 : vector<8x128xi1>, vector<8x128xf32>
    %cst_103 = arith.constant dense<0.000000e+00> : vector<128xf32>
    %120 = vector.multi_reduction <add>, %119, %cst_103 [0] : vector<8x128xf32> to vector<128xf32>
    %121 = vector.shape_cast %120 : vector<128xf32> to vector<1x128xf32>
    %122 = arith.truncf %121 : vector<1x128xf32> to vector<1x128xbf16>
    %c0_104 = arith.constant 0 : index
    %c0_105 = arith.constant 0 : index
    %123 = vector.load %arg10[%c0_104, %c0_105] : memref<640x128xbf16, #tpu.memory_space<vmem>>, vector<128x128xbf16>
    %cst_106 = arith.constant dense<0.000000e+00> : vector<1x128xf32>
    %124 = tpu.matmul %122, %123, %cst_106 {dimension_numbers = #tpu.dot_dimension_numbers<[1], [0], [0], [1], [0, 0, 1, 1], [], []>} : vector<1x128xbf16>, vector<128x128xbf16>, vector<1x128xf32> -> vector<1x128xf32>
    %125 = arith.addf %115, %124 : vector<1x128xf32>
    %c1_i32 = arith.constant 1 : i32
    %126 = vector.broadcast %c1_i32 : i32 to vector<8x128xi32>
    %127 = arith.cmpi eq, %114, %126 : vector<8x128xi32>
    %cst_107 = arith.constant 0.000000e+00 : f32
    %128 = vector.broadcast %cst_107 : f32 to vector<8x128xf32>
    %129 = arith.select %127, %113, %128 : vector<8x128xi1>, vector<8x128xf32>
    %cst_108 = arith.constant dense<0.000000e+00> : vector<128xf32>
    %130 = vector.multi_reduction <add>, %129, %cst_108 [0] : vector<8x128xf32> to vector<128xf32>
    %131 = vector.shape_cast %130 : vector<128xf32> to vector<1x128xf32>
    %132 = arith.truncf %131 : vector<1x128xf32> to vector<1x128xbf16>
    %c128 = arith.constant 128 : index
    %c0_109 = arith.constant 0 : index
    %133 = vector.load %arg10[%c128, %c0_109] : memref<640x128xbf16, #tpu.memory_space<vmem>>, vector<128x128xbf16>
    %cst_110 = arith.constant dense<0.000000e+00> : vector<1x128xf32>
    %134 = tpu.matmul %132, %133, %cst_110 {dimension_numbers = #tpu.dot_dimension_numbers<[1], [0], [0], [1], [0, 0, 1, 1], [], []>} : vector<1x128xbf16>, vector<128x128xbf16>, vector<1x128xf32> -> vector<1x128xf32>
    %135 = arith.addf %125, %134 : vector<1x128xf32>
    %c2_i32 = arith.constant 2 : i32
    %136 = vector.broadcast %c2_i32 : i32 to vector<8x128xi32>
    %137 = arith.cmpi eq, %114, %136 : vector<8x128xi32>
    %cst_111 = arith.constant 0.000000e+00 : f32
    %138 = vector.broadcast %cst_111 : f32 to vector<8x128xf32>
    %139 = arith.select %137, %113, %138 : vector<8x128xi1>, vector<8x128xf32>
    %cst_112 = arith.constant dense<0.000000e+00> : vector<128xf32>
    %140 = vector.multi_reduction <add>, %139, %cst_112 [0] : vector<8x128xf32> to vector<128xf32>
    %141 = vector.shape_cast %140 : vector<128xf32> to vector<1x128xf32>
    %142 = arith.truncf %141 : vector<1x128xf32> to vector<1x128xbf16>
    %c256 = arith.constant 256 : index
    %c0_113 = arith.constant 0 : index
    %143 = vector.load %arg10[%c256, %c0_113] : memref<640x128xbf16, #tpu.memory_space<vmem>>, vector<128x128xbf16>
    %cst_114 = arith.constant dense<0.000000e+00> : vector<1x128xf32>
    %144 = tpu.matmul %142, %143, %cst_114 {dimension_numbers = #tpu.dot_dimension_numbers<[1], [0], [0], [1], [0, 0, 1, 1], [], []>} : vector<1x128xbf16>, vector<128x128xbf16>, vector<1x128xf32> -> vector<1x128xf32>
    %145 = arith.addf %135, %144 : vector<1x128xf32>
    %c3_i32 = arith.constant 3 : i32
    %146 = vector.broadcast %c3_i32 : i32 to vector<8x128xi32>
    %147 = arith.cmpi eq, %114, %146 : vector<8x128xi32>
    %cst_115 = arith.constant 0.000000e+00 : f32
    %148 = vector.broadcast %cst_115 : f32 to vector<8x128xf32>
    %149 = arith.select %147, %113, %148 : vector<8x128xi1>, vector<8x128xf32>
    %cst_116 = arith.constant dense<0.000000e+00> : vector<128xf32>
    %150 = vector.multi_reduction <add>, %149, %cst_116 [0] : vector<8x128xf32> to vector<128xf32>
    %151 = vector.shape_cast %150 : vector<128xf32> to vector<1x128xf32>
    %152 = arith.truncf %151 : vector<1x128xf32> to vector<1x128xbf16>
    %c384 = arith.constant 384 : index
    %c0_117 = arith.constant 0 : index
    %153 = vector.load %arg10[%c384, %c0_117] : memref<640x128xbf16, #tpu.memory_space<vmem>>, vector<128x128xbf16>
    %cst_118 = arith.constant dense<0.000000e+00> : vector<1x128xf32>
    %154 = tpu.matmul %152, %153, %cst_118 {dimension_numbers = #tpu.dot_dimension_numbers<[1], [0], [0], [1], [0, 0, 1, 1], [], []>} : vector<1x128xbf16>, vector<128x128xbf16>, vector<1x128xf32> -> vector<1x128xf32>
    %155 = arith.addf %145, %154 : vector<1x128xf32>
    %c4_i32 = arith.constant 4 : i32
    %156 = vector.broadcast %c4_i32 : i32 to vector<8x128xi32>
    %157 = arith.cmpi eq, %114, %156 : vector<8x128xi32>
    %cst_119 = arith.constant 0.000000e+00 : f32
    %158 = vector.broadcast %cst_119 : f32 to vector<8x128xf32>
    %159 = arith.select %157, %113, %158 : vector<8x128xi1>, vector<8x128xf32>
    %cst_120 = arith.constant dense<0.000000e+00> : vector<128xf32>
    %160 = vector.multi_reduction <add>, %159, %cst_120 [0] : vector<8x128xf32> to vector<128xf32>
    %161 = vector.shape_cast %160 : vector<128xf32> to vector<1x128xf32>
    %162 = arith.truncf %161 : vector<1x128xf32> to vector<1x128xbf16>
    %c512 = arith.constant 512 : index
    %c0_121 = arith.constant 0 : index
    %163 = vector.load %arg10[%c512, %c0_121] : memref<640x128xbf16, #tpu.memory_space<vmem>>, vector<128x128xbf16>
    %cst_122 = arith.constant dense<0.000000e+00> : vector<1x128xf32>
    %164 = tpu.matmul %162, %163, %cst_122 {dimension_numbers = #tpu.dot_dimension_numbers<[1], [0], [0], [1], [0, 0, 1, 1], [], []>} : vector<1x128xbf16>, vector<128x128xbf16>, vector<1x128xf32> -> vector<1x128xf32>
    %165 = arith.addf %155, %164 : vector<1x128xf32>
    %c0_123 = arith.constant 0 : index
    %c0_124 = arith.constant 0 : index
    %166 = vector.load %arg11[%c0_123, %c0_124] : memref<1x128xf32, #tpu.memory_space<vmem>>, vector<1x128xf32>
    %167 = arith.addf %165, %166 : vector<1x128xf32>
    %cst_125 = arith.constant 0.000000e+00 : f32
    %168 = vector.broadcast %cst_125 : f32 to vector<1x128xf32>
    %169 = arith.maximumf %167, %168 : vector<1x128xf32>
    %170 = arith.truncf %169 : vector<1x128xf32> to vector<1x128xbf16>
    %c0_126 = arith.constant 0 : index
    %c0_127 = arith.constant 0 : index
    %171 = vector.load %arg12[%c0_126, %c0_127] : memref<128x128xbf16, #tpu.memory_space<vmem>>, vector<128x128xbf16>
    %cst_128 = arith.constant dense<0.000000e+00> : vector<1x128xf32>
    %172 = tpu.matmul %170, %171, %cst_128 {dimension_numbers = #tpu.dot_dimension_numbers<[1], [0], [0], [1], [0, 0, 1, 1], [], []>} : vector<1x128xbf16>, vector<128x128xbf16>, vector<1x128xf32> -> vector<1x128xf32>
    %c0_129 = arith.constant 0 : index
    %c0_130 = arith.constant 0 : index
    %173 = vector.load %arg13[%c0_129, %c0_130] : memref<1x128xf32, #tpu.memory_space<vmem>>, vector<1x128xf32>
    %174 = arith.addf %172, %173 : vector<1x128xf32>
    %cst_131 = arith.constant 0.000000e+00 : f32
    %175 = vector.broadcast %cst_131 : f32 to vector<1x128xf32>
    %176 = arith.maximumf %174, %175 : vector<1x128xf32>
    %177 = arith.truncf %176 : vector<1x128xf32> to vector<1x128xbf16>
    %c0_132 = arith.constant 0 : index
    %c0_133 = arith.constant 0 : index
    %178 = vector.load %arg14[%c0_132, %c0_133] : memref<128x128xbf16, #tpu.memory_space<vmem>>, vector<128x128xbf16>
    %cst_134 = arith.constant dense<0.000000e+00> : vector<1x128xf32>
    %179 = tpu.matmul %177, %178, %cst_134 {dimension_numbers = #tpu.dot_dimension_numbers<[1], [0], [0], [1], [0, 0, 1, 1], [], []>} : vector<1x128xbf16>, vector<128x128xbf16>, vector<1x128xf32> -> vector<1x128xf32>
    %c0_135 = arith.constant 0 : index
    %c0_136 = arith.constant 0 : index
    %180 = vector.load %arg15[%c0_135, %c0_136] : memref<1x128xf32, #tpu.memory_space<vmem>>, vector<1x128xf32>
    %181 = arith.addf %179, %180 : vector<1x128xf32>
    %c0_137 = arith.constant 0 : index
    %c0_138 = arith.constant 0 : index
    %c0_139 = arith.constant 0 : index
    %182 = vector.load %arg16[%c0_137, %c0_138, %c0_139] : memref<1x1x128xf32, #tpu.memory_space<vmem>>, vector<1x1x128xf32>
    %183 = vector.shape_cast %182 : vector<1x1x128xf32> to vector<1x128xf32>
    %184 = vector.shape_cast %181 : vector<1x128xf32> to vector<1x1x128xf32>
    tpu.vector_store %arg16[%c0_137, %c0_138, %c0_139], %184 {strides = array<i32>} : memref<1x1x128xf32, #tpu.memory_space<vmem>>, vector<1x1x128xf32>,
    return
  }
  func.func @transform_0(%arg0: i32) -> (i32, i32, i32) {
    %c0_i32 = arith.constant 0 : i32
    %c0_i32_0 = arith.constant 0 : i32
    %c0_i32_1 = arith.constant 0 : i32
    return %arg0, %c0_i32, %c0_i32_0 : i32, i32, i32
  }
  func.func @transform_1(%arg0: i32) -> (i32, i32, i32) {
    %c0_i32 = arith.constant 0 : i32
    %c0_i32_0 = arith.constant 0 : i32
    %c0_i32_1 = arith.constant 0 : i32
    %c0_i32_2 = arith.constant 0 : i32
    return %c0_i32, %c0_i32_0, %c0_i32_1 : i32, i32, i32
  }
  func.func @transform_2(%arg0: i32) -> (i32, i32, i32) {
    %c0_i32 = arith.constant 0 : i32
    %c0_i32_0 = arith.constant 0 : i32
    %c0_i32_1 = arith.constant 0 : i32
    %c0_i32_2 = arith.constant 0 : i32
    return %c0_i32, %c0_i32_0, %c0_i32_1 : i32, i32, i32
  }
  func.func @transform_3(%arg0: i32) -> (i32, i32, i32) {
    %c0_i32 = arith.constant 0 : i32
    %c0_i32_0 = arith.constant 0 : i32
    %c0_i32_1 = arith.constant 0 : i32
    %c0_i32_2 = arith.constant 0 : i32
    return %c0_i32, %c0_i32_0, %c0_i32_1 : i32, i32, i32
  }
  func.func @transform_4(%arg0: i32) -> (i32, i32) {
    %c0_i32 = arith.constant 0 : i32
    %c0_i32_0 = arith.constant 0 : i32
    %c0_i32_1 = arith.constant 0 : i32
    return %c0_i32, %c0_i32_0 : i32, i32
  }
  func.func @transform_5(%arg0: i32) -> (i32, i32, i32) {
    %c0_i32 = arith.constant 0 : i32
    %c0_i32_0 = arith.constant 0 : i32
    %c0_i32_1 = arith.constant 0 : i32
    %c0_i32_2 = arith.constant 0 : i32
    return %c0_i32, %c0_i32_0, %c0_i32_1 : i32, i32, i32
  }
  func.func @transform_6(%arg0: i32) -> (i32, i32, i32) {
    %c0_i32 = arith.constant 0 : i32
    %c0_i32_0 = arith.constant 0 : i32
    %c0_i32_1 = arith.constant 0 : i32
    %c0_i32_2 = arith.constant 0 : i32
    return %c0_i32, %c0_i32_0, %c0_i32_1 : i32, i32, i32
  }
  func.func @transform_7(%arg0: i32) -> (i32, i32, i32) {
    %c0_i32 = arith.constant 0 : i32
    %c0_i32_0 = arith.constant 0 : i32
    %c0_i32_1 = arith.constant 0 : i32
    %c0_i32_2 = arith.constant 0 : i32
    return %c0_i32, %c0_i32_0, %c0_i32_1 : i32, i32, i32
  }
  func.func @transform_8(%arg0: i32) -> (i32, i32) {
    %c0_i32 = arith.constant 0 : i32
    %c0_i32_0 = arith.constant 0 : i32
    %c0_i32_1 = arith.constant 0 : i32
    return %c0_i32, %c0_i32_0 : i32, i32
  }
  func.func @transform_9(%arg0: i32) -> (i32, i32) {
    %c0_i32 = arith.constant 0 : i32
    %c0_i32_0 = arith.constant 0 : i32
    %c0_i32_1 = arith.constant 0 : i32
    return %c0_i32, %c0_i32_0 : i32, i32
  }
  func.func @transform_10(%arg0: i32) -> (i32, i32) {
    %c0_i32 = arith.constant 0 : i32
    %c0_i32_0 = arith.constant 0 : i32
    %c0_i32_1 = arith.constant 0 : i32
    return %c0_i32, %c0_i32_0 : i32, i32
  }
  func.func @transform_11(%arg0: i32) -> (i32, i32) {
    %c0_i32 = arith.constant 0 : i32
    %c0_i32_0 = arith.constant 0 : i32
    %c0_i32_1 = arith.constant 0 : i32
    return %c0_i32, %c0_i32_0 : i32, i32
  }
  func.func @transform_12(%arg0: i32) -> (i32, i32) {
    %c0_i32 = arith.constant 0 : i32
    %c0_i32_0 = arith.constant 0 : i32
    %c0_i32_1 = arith.constant 0 : i32
    return %c0_i32, %c0_i32_0 : i32, i32
  }
  func.func @transform_13(%arg0: i32) -> (i32, i32) {
    %c0_i32 = arith.constant 0 : i32
    %c0_i32_0 = arith.constant 0 : i32
    %c0_i32_1 = arith.constant 0 : i32
    return %c0_i32, %c0_i32_0 : i32, i32
  }
  func.func @transform_14(%arg0: i32) -> (i32, i32) {
    %c0_i32 = arith.constant 0 : i32
    %c0_i32_0 = arith.constant 0 : i32
    %c0_i32_1 = arith.constant 0 : i32
    return %c0_i32, %c0_i32_0 : i32, i32
  }
  func.func @transform_15(%arg0: i32) -> (i32, i32, i32) {
    %c0_i32 = arith.constant 0 : i32
    %c0_i32_0 = arith.constant 0 : i32
    %c0_i32_1 = arith.constant 0 : i32
    return %arg0, %c0_i32, %c0_i32_0 : i32, i32, i32
  }
}

</mosaic_0001>

<bundles_post_ra>
// kernel: mynet_forward.1
= control target key start
LH: loop header
LB: loop body
LE: loop exit
PB: predicated region body
PF: predicated region fallthrough
CT: control target
= control target key end

     0   :  { %s5862_s0 = inlined_call_operand.vmem [shape: f32[2,32,128], index: 0, kind: input, shape index: {}]   ;;  %s5863_s1 = inlined_call_operand.vmem [shape: f32[5,28,32], index: 1, kind: input, shape index: {}]   ;;  %s5864_s2 = inlined_call_operand.vmem [shape: bf16[5,128,256], index: 2, kind: input, shape index: {}]   ;;  %s5865_s3 = inlined_call_operand.vmem [shape: f32[2,14,28], index: 3, kind: input, shape index: {}]   ;;  %s5866_s4 = inlined_call_operand.vmem [shape: f32[1,128], index: 4, kind: input, shape index: {}]   ;;  %s5867_s5 = inlined_call_operand.hbm [shape: f32[5,10,14], index: 5, kind: input, shape index: {}]   ;;  %s5868_s6 = inlined_call_operand.hbm [shape: bf16[5,128,256], index: 6, kind: input, shape index: {}]   ;;  %s5869_s7 = inlined_call_operand.hbm [shape: f32[2,8,10], index: 7, kind: input, shape index: {}]   ;;  %s5870_s8 = inlined_call_operand.vmem [shape: f32[1,128], index: 8, kind: input, shape index: {}]   ;;  %s5871_s9 = inlined_call_operand.hbm [shape: bf16[640,128], index: 9, kind: input, shape index: {}]   ;;  %s5872_s10 = inlined_call_operand.vmem [shape: f32[1,128], index: 10, kind: input, shape index: {}]   ;;  %s5873_s11 = inlined_call_operand.hbm [shape: bf16[128,128], index: 11, kind: input, shape index: {}]   ;;  %s5874_s12 = inlined_call_operand.vmem [shape: f32[1,128], index: 12, kind: input, shape index: {}]   ;;  %s5875_s13 = inlined_call_operand.hbm [shape: bf16[128,128], index: 13, kind: input, shape index: {}]   ;;  %s5876_s14 = inlined_call_operand.vmem [shape: f32[1,128], index: 14, kind: input, shape index: {}]   ;;  %s5877_s15 = inlined_call_operand.hbm [shape: f32[2,1,128], index: 15, kind: output, shape index: {}]  }
   0x1   :  { %5887 = sst [smem:[#allocation26_spill]] %s5867_s5 }
   0x2   :  { %5888 = sst [smem:[#allocation27_spill]] %s5868_s6 }
   0x3   :  { %5889 = sst [smem:[#allocation28_spill]] %s5871_s9 }
   0x4   :  { %5890 = sst [smem:[#allocation29_spill]] %s5874_s12 }
   0x5   :  { %5891 = sst [smem:[#allocation30_spill]] %s5876_s14 }
   0x6   :  { %5892 = sst [smem:[#allocation31_spill]] %s5877_s15 }
   0x7   :  { %20 = vsyncpa [#allocation3], 0 }
   0x8   :  { %21 = vsyncpa [#allocation6], 0 }
   0x9   :  { %22 = vsyncpa [#allocation9], 0 }
   0xa   :  { %23 = vsyncpa [#allocation12], 0 }
   0xb   :  { %24 = vsyncpa [#allocation4], 0 }
   0xc   :  { %26 = vsyncpa [#allocation4 + $0x1], 0  ;;  %s5004_s18 = smov 0   ;;  %s5006_s19 = smov 0  }
   0xd   :  { %s5008_s20 = smov 0   ;;  %s5010_s21 = smov 0  }
   0xe LB: > { %5893 = sst [smem:[#allocation19_spill]] %s4900_s18  ;;  %s5025_s22 = sadd.s32 4294967295, %s4912_s21   ;;  %s4912_s21 = sphi %s5010_s21, %s5914_s21   ;;  %s4908_s20 = sphi %s5008_s20, %s5916_s20   ;;  %s4904_s19 = sphi %s5006_s19, %s5918_s19   ;;  %s4900_s18 = sphi %s5004_s18, %s5917_s18  }
   0xf   : > { %5894 = sst [smem:[#allocation20_spill]] %s4908_s20  ;;  %s3302_s23 = sadd.s32 4294967294, %s4912_s21  }
  0x10   : > { %5895 = sst [smem:[#allocation21_spill]] %s4912_s21  ;;  %s5029_s24 = sadd.s32 1, %s4912_s21  }
  0x11   : > { %5896 = sst [smem:[#allocation22_spill]] %s5029_s24  ;;  %s359_s25 = sadd.s32 1, %s4908_s20 }
  0x12   : > { %s356_s26 = ssub.s32 %s4912_s21, %s5029_s24  ;;  %p369_p0 = scmp.ne.s32.totalorder %s4908_s20, %s4904_s19 }
  0x13   : > { %p357_p1 = scmp.eq.s32.totalorder %s356_s26, 0  ;;  %p370_p2 = scmp.eq.s32.totalorder %s5025_s22, 1 }
  0x14   : > { %p375_p3 = scmp.ne.s32.totalorder %s4904_s19, %s4900_s18  ;;  %p376_p4 = scmp.eq.s32.totalorder %s3302_s23, 1 }
  0x15   : > { %s5040_s27 = scalar_select %p357_p1, %s4908_s20, %s359_s25  }
  0x16   : > { %p5042_p5 = por %p370_p2, %p369_p0  ;;  %p5046_p6 = por %p376_p4, %p375_p3 }
  0x17   : > { %5897 = sst [smem:[#allocation23_spill]] %s5040_s27  ;;  %p3303_p7 = scmp.ge.s32.totalorder %s4912_s21, 1 }
  0x18   : > { %s5898_s28 = scalar_select %p5042_p5, 1, 0 }
  0x19   : > { %s5900_s29 = scalar_select %p5046_p6, 1, 0 }
  0x1a   : > { %5899 = sst [smem:[#allocation24_spill]] %s5898_s28  ;;  %p383_p8 = scmp.lt.s32.totalorder %s4912_s21, 3 }
  0x1b   : > { %5901 = sst [smem:[#allocation25_spill]] %s5900_s29  ;;  %p4597_p9 = scmp.eq.s32.totalorder %s5025_s22, 0 }
  0x1c   : > { %p5053_p10 = pnand %p3303_p7, %p383_p8  ;;  %s5903_s6 = sld [smem:[#allocation27_spill]] }
  0x1d   : > { %s5904_s9 = sld [smem:[#allocation28_spill]]  ;;  %s4914_s24 = smov [#allocation5]  }
  0x1e   : > { %p4574_p11 = pneg %p5053_p10  ;;  %s422_s29 = sshll.u32 %s4914_s24, 4  ;;  %s423_s29 = int_to_ptr.vmem [resolvable:$true] %s422_s29 }
  0x1f   : > { %s4915_s16 = smov 128   ;;  %s4916_s17 = smov 8  }
  0x20   : > { %p5067_p12 = pnand %p4597_p9, %p4574_p11  ;;  %s4918_s25 = smov 64  }
  0x21   : > { %s4919_s26 = smov 4   ;;  %s5906_s5 = sld [smem:[#allocation26_spill]] }
  0x22   : > { %s420_s23 = sshll.u32 %s5903_s6, 4  ;;  %s4917_s6 = smov [#allocation8]   ;;  %s421_s23 = int_to_ptr.hbm [resolvable:$true] %s420_s23 }
  0x23   : > { %s451_s27 = sshll.u32 %s5904_s9, 4  ;;  %s453_s18 = sshll.u32 %s4917_s6, 4  ;;  %s452_s27 = int_to_ptr.hbm [resolvable:$true] %s451_s27  ;;  %s454_s18 = int_to_ptr.vmem [resolvable:$true] %s453_s18 }
  0x24   : > { %4580 = dma.hbm_to_vmem [thread:$0]  (!%p5067_p12), %s421_s23, 10240, %s423_s29, [#allocation6], %s4915_s16, %s4915_s16, %s4916_s17  }
  0x25   : > { %4586 = dma.hbm_to_vmem [thread:$0]  (!%p5067_p12), %s452_s27, 5120, %s454_s18, [#allocation9], %s4918_s25, %s4918_s25, %s4919_s26  }
  0x26   : > { %s4920_s24 = smov [#allocation2]   ;;  %s434_s29 = sshll.u32 %s5869_s7, 4  ;;  %s435_s29 = int_to_ptr.hbm [resolvable:$true] %s434_s29 }
  0x27   : > { %s406_s14 = sshll.u32 %s5906_s5, 4  ;;  %s408_s28 = sshll.u32 %s4920_s24, 4  ;;  %s407_s14 = int_to_ptr.hbm [resolvable:$true] %s406_s14  ;;  %s409_s28 = int_to_ptr.vmem [resolvable:$true] %s408_s28 }
  0x28   : > { %4577 = dma.hbm_to_vmem [thread:$0]  (!%p5067_p12), %s407_s14, 1280, %s409_s28, [#allocation3], %s4915_s16, %s4915_s16, %s4916_s17  }
  0x29   : > { %s4921_s6 = smov [#allocation7]   ;;  %s468_s9 = sshll.u32 %s5873_s11, 4  ;;  %s469_s9 = int_to_ptr.hbm [resolvable:$true] %s468_s9 }
  0x2a   : > { %s436_s23 = sshll.u32 %s4921_s6, 4  ;;  %s485_s5 = sshll.u32 %s5875_s13, 4  ;;  %s437_s23 = int_to_ptr.vmem [resolvable:$true] %s436_s23  ;;  %s486_s5 = int_to_ptr.hbm [resolvable:$true] %s485_s5 }
  0x2b   : > { %4583 = dma.hbm_to_vmem [thread:$0]  (!%p5067_p12), %s435_s29, 256, %s437_s23, [#allocation6], %s4915_s16, %s4915_s16, %s4916_s17  }
  0x2c   : > { %s4922_s12 = smov [#allocation10]   ;;  %s4923_s14 = smov [#allocation11]  }
  0x2d   : > { %s470_s15 = sshll.u32 %s4922_s12, 4  ;;  %s487_s28 = sshll.u32 %s4923_s14, 4  ;;  %s471_s15 = int_to_ptr.vmem [resolvable:$true] %s470_s15  ;;  %s488_s28 = int_to_ptr.vmem [resolvable:$true] %s487_s28 }
  0x2e   : > { %4589 = dma.hbm_to_vmem [thread:$0]  (!%p5067_p12), %s469_s9, 1024, %s471_s15, [#allocation9], %s4918_s25, %s4918_s25, %s4919_s26  }
  0x2f   : > { %4592 = dma.hbm_to_vmem [thread:$0]  (!%p5067_p12), %s486_s5, 1024, %s488_s28, [#allocation12], %s4918_s25, %s4918_s25, %s4919_s26  }
  0x30   : > { %514 = sbr.rel (%p5053_p10) target bundleno = 2066 (0x812), region = 80 }
  0x35   : > { %4879 = dma.done.wait (%p4597_p9), [#allocation3], 1280  }
  0x36   : > { %4881 = vsyncadd (%p4597_p9), [#allocation3], 4294966016 }
  0x37   : > { %4883 = dma.done.wait (%p4597_p9), [#allocation6], 10496  }
  0x38   : > { %4885 = vsyncadd (%p4597_p9), [#allocation6], 4294956800 }
  0x39   : > { %4887 = dma.done.wait (%p4597_p9), [#allocation9], 6144  }
  0x3a   : > { %4889 = vsyncadd (%p4597_p9), [#allocation9], 4294961152 }
  0x3b   : > { %4891 = dma.done.wait (%p4597_p9), [#allocation12], 1024  }
  0x3c   : > { %4893 = vsyncadd (%p4597_p9), [#allocation12], 4294966272  ;;  %p587_p13 = scmp.lt.s32.totalorder %s5025_s22, 1  ;;  %vm600_vm0 = vcmask 261120   ;;  %v3324_v4 = vld [vmem:[%s5863_s1 + $0x20] sm:$0xff]  ;;  %v3325_v33 = vld [vmem:[%s5863_s1 + $0x28] sm:$0xff] }
  0x3d   : > { %v596_v5 = vld [vmem:[%s5863_s1] sm:$0xff]  ;;  %v3406_v6 = vld [vmem:[%s5864_s2 + $0xf0] sm:$0xf]  ;;  %v4355_v7 = vld [vmem:[%s5864_s2 + $0xf4] sm:$0xf0]  ;;  %vm1543_vm1 = vcmask 1043456  }
  0x3e   : > { %s588_s5 = scalar_select %p587_p13, %s5025_s22, 1  ;;  %v4354_v8 = vld [vmem:[%s5864_s2 + $0xf4] sm:$0xf]  ;;  %v3407_v9 = vor.u32 %v4355_v7, %v3406_v6  ;;  %v3408_v10 = vld [vmem:[%s5864_s2 + $0xf8] sm:$0xf0]  ;;  %v597_v34 = vld [vmem:[%s5863_s1 + $0x8] sm:$0xff] }
  0x3f   : > { %v3398_v11 = vld [vmem:[%s5864_s2 + $0xe0] sm:$0xf]  ;;  %v4353_v12 = vld [vmem:[%s5864_s2 + $0xe4] sm:$0xf0]  ;;  %v3411_v13 = vor.u32 %v4354_v8, %v3408_v10  ;;  %v4352_v14 = vld [vmem:[%s5864_s2 + $0xe4] sm:$0xf] }
  0x40   : > { %s4323_s20 = sshll.u32 %s588_s5, 5  ;;  %v3400_v15 = vld [vmem:[%s5864_s2 + $0xe8] sm:$0xf0]  ;;  %v3470_v16 = vld [vmem:[%s5864_s2 + $0x70] sm:$0xf]  ;;  %805 = vmatpush.bf16.msra.mxu2 %v3407_v9  ;;  %v3399_v24 = vor.u32 %v4353_v12, %v3398_v11  ;;  %vm1536_vm2 = vcmask 228352  }
  0x41   : > { %s591_s17 = scalar_lea.vmem %s5862_s0, %s4323_s20  ;;  %v4339_v17 = vld [vmem:[%s5864_s2 + $0x74] sm:$0xf0]  ;;  %v4338_v18 = vld [vmem:[%s5864_s2 + $0x74] sm:$0xf]  ;;  %v3472_v19 = vld [vmem:[%s5864_s2 + $0x78] sm:$0xf0]  ;;  %824 = vmatpush.bf16.msra.mxu3 %v3411_v13  ;;  %v3403_v25 = vor.u32 %v4352_v14, %v3400_v15 }
  0x42   : > { %v5118_v0 = vld [vmem:[%s591_s17 + $0x18] sm:$0xff]  ;;  %v5120_v1 = vld [vmem:[%s591_s17 + $0x10] sm:$0xff]  ;;  %v5124_v2 = vld [vmem:[%s591_s17 + $0x8] sm:$0xff]  ;;  %v3471_v20 = vor.u32 %v4339_v17, %v3470_v16  ;;  %v3475_v21 = vor.u32 %v4338_v18, %v3472_v19  ;;  %vm1674_vm3 = vcmask 1045504   ;;  %vm1667_vm4 = vcmask 113664   ;;  %s5907_s20 = sld [smem:[#allocation29_spill]] }
  0x43   : > { %689 = vmatpush.msra.mxu1 %v5118_v0  ;;  %625 = vmatpush.msra.mxu0 %v5118_v0  ;;  %v5127_v3 = vld [vmem:[%s591_s17] sm:$0xff]  ;;  %v3390_v22 = vld [vmem:[%s5864_s2 + $0xd0] sm:$0xf]  ;;  %v4351_v23 = vld [vmem:[%s5864_s2 + $0xd4] sm:$0xf0]  ;;  %vm2475_vm5 = vcmask 1041408  }
  0x44   : > { %v4350_v26 = vld [vmem:[%s5864_s2 + $0xd4] sm:$0xf]  ;;  %v3462_v27 = vld [vmem:[%s5864_s2 + $0x60] sm:$0xf]  ;;  %v4337_v28 = vld [vmem:[%s5864_s2 + $0x64] sm:$0xf0]  ;;  %806 = vmatpush.bf16.msra.mxu2 %v3399_v24  ;;  %v3391_v39 = vor.u32 %v4351_v23, %v3390_v22 }
  0x45   : > { %690 = vmatpush.msra.mxu1 %v5120_v1  ;;  %626 = vmatpush.msra.mxu0 %v5120_v1  ;;  %v3392_v29 = vld [vmem:[%s5864_s2 + $0xd8] sm:$0xf0]  ;;  %v3463_v30 = vor.u32 %v4337_v28, %v3462_v27  ;;  %v4336_v31 = vld [vmem:[%s5864_s2 + $0x64] sm:$0xf]  ;;  %v3464_v32 = vld [vmem:[%s5864_s2 + $0x68] sm:$0xf0] }
  0x46   : > { %v3467_v35 = vor.u32 %v4336_v31, %v3464_v32  ;;  %v3454_v36 = vld [vmem:[%s5864_s2 + $0x50] sm:$0xf]  ;;  %v4335_v37 = vld [vmem:[%s5864_s2 + $0x54] sm:$0xf0]  ;;  %v4334_v38 = vld [vmem:[%s5864_s2 + $0x54] sm:$0xf]  ;;  %825 = vmatpush.bf16.msra.mxu3 %v3403_v25  ;;  %v3395_v40 = vor.u32 %v4350_v26, %v3392_v29 }
  0x47   : > { %691 = vmatpush.msra.mxu1 %v5124_v2  ;;  %627 = vmatpush.msra.mxu0 %v5124_v2  ;;  %v3382_v41 = vld [vmem:[%s5864_s2 + $0xc0] sm:$0xf]  ;;  %v4349_v42 = vld [vmem:[%s5864_s2 + $0xc4] sm:$0xf0]  ;;  %v3456_v43 = vld [vmem:[%s5864_s2 + $0x58] sm:$0xf0]  ;;  %v3455_v46 = vor.u32 %v4335_v37, %v3454_v36 }
  0x48   : > { %v4348_v44 = vld [vmem:[%s5864_s2 + $0xc4] sm:$0xf]  ;;  %v3384_v45 = vld [vmem:[%s5864_s2 + $0xc8] sm:$0xf0]  ;;  %v3459_v47 = vor.u32 %v4334_v38, %v3456_v43  ;;  %v3446_v48 = vld [vmem:[%s5864_s2 + $0x40] sm:$0xf]  ;;  %807 = vmatpush.bf16.msra.mxu2 %v3391_v39  ;;  %v3383_v52 = vor.u32 %v4349_v42, %v3382_v41 }
  0x49   : > { %692 = vmatpush.msra.mxu1 %v5127_v3  ;;  %628 = vmatpush.msra.mxu0 %v5127_v3  ;;  %v4333_v49 = vld [vmem:[%s5864_s2 + $0x44] sm:$0xf0]  ;;  %v4332_v50 = vld [vmem:[%s5864_s2 + $0x44] sm:$0xf]  ;;  %v3448_v51 = vld [vmem:[%s5864_s2 + $0x48] sm:$0xf0]  ;;  %v3387_v53 = vor.u32 %v4348_v44, %v3384_v45 }
  0x4a   : > { %3328 = vmatmul.msk.f32.vlgmr.msra.gmra.mxu1 %vm600_vm0, %v3324_v4  ;;  %3320 = vmatmul.msk.f32.vlgmr.msra.gmra.mxu0 %vm600_vm0, %v596_v5  ;;  %v3374_v54 = vld [vmem:[%s5864_s2 + $0xb0] sm:$0xf]  ;;  %v4347_v55 = vld [vmem:[%s5864_s2 + $0xb4] sm:$0xf0]  ;;  %v4346_v56 = vld [vmem:[%s5864_s2 + $0xb4] sm:$0xf]  ;;  %v3447_v58 = vor.u32 %v4333_v49, %v3446_v48  ;;  %v3451_v59 = vor.u32 %v4332_v50, %v3448_v51 }
  0x4b   : > { %923 = vmatpush.bf16.msrb.mxu0 %v3471_v20  ;;  %942 = vmatpush.bf16.msrb.mxu1 %v3475_v21  ;;  %v3376_v57 = vld [vmem:[%s5864_s2 + $0xb8] sm:$0xf0]  ;;  %v3326_v60 = vld [vmem:[%s5863_s1 + $0x30] sm:$0xff]  ;;  %v3375_v62 = vor.u32 %v4347_v55, %v3374_v54  ;;  %v3327_v4 = vld [vmem:[%s5863_s1 + $0x38] sm:$0xf]  ;;  %vm2471_vm6 = vcmask 80896  }
  0x4c   : > { %826 = vmatpush.bf16.msra.mxu3 %v3395_v40  ;;  %v598_v61 = vld [vmem:[%s5863_s1 + $0x10] sm:$0xff]  ;;  %808 = vmatpush.bf16.msra.mxu2 %v3383_v52  ;;  %v3379_v63 = vor.u32 %v4346_v56, %v3376_v57  ;;  %v599_v5 = vld [vmem:[%s5863_s1 + $0x18] sm:$0xf]  ;;  %v3366_v6 = vld [vmem:[%s5864_s2 + $0xa0] sm:$0xf]  ;;  %s585_s30 = sand.u32 1, %s4904_s19  }
  0x4d   : > { %v4345_v7 = vld [vmem:[%s5864_s2 + $0xa4] sm:$0xf0]  ;;  %v4344_v8 = vld [vmem:[%s5864_s2 + $0xa4] sm:$0xf]  ;;  %v3368_v10 = vld [vmem:[%s5864_s2 + $0xa8] sm:$0xf0] }
  0x4e   : > { %v3367_v9 = vor.u32 %v4345_v7, %v3366_v6  ;;  %v3371_v11 = vor.u32 %v4344_v8, %v3368_v10  ;;  %v3438_v12 = vld [vmem:[%s5864_s2 + $0x30] sm:$0xf]  ;;  %v4331_v13 = vld [vmem:[%s5864_s2 + $0x34] sm:$0xf0]  ;;  %v4330_v14 = vld [vmem:[%s5864_s2 + $0x34] sm:$0xf] }
  0x4f   : > { %924 = vmatpush.bf16.msrb.mxu0 %v3463_v30  ;;  %943 = vmatpush.bf16.msrb.mxu1 %v3467_v35  ;;  %v3439_v15 = vor.u32 %v4331_v13, %v3438_v12  ;;  %v3440_v16 = vld [vmem:[%s5864_s2 + $0x38] sm:$0xf0]  ;;  %v3358_v17 = vld [vmem:[%s5864_s2 + $0x90] sm:$0xf]  ;;  %v4343_v18 = vld [vmem:[%s5864_s2 + $0x94] sm:$0xf0] }
  0x50   : > { %827 = vmatpush.bf16.msra.mxu3 %v3387_v53  ;;  %809 = vmatpush.bf16.msra.mxu2 %v3375_v62  ;;  %v3443_v19 = vor.u32 %v4330_v14, %v3440_v16  ;;  %v3359_v20 = vor.u32 %v4343_v18, %v3358_v17  ;;  %v4342_v21 = vld [vmem:[%s5864_s2 + $0x94] sm:$0xf]  ;;  %v3360_v22 = vld [vmem:[%s5864_s2 + $0x98] sm:$0xf0]  ;;  %v3430_v23 = vld [vmem:[%s5864_s2 + $0x20] sm:$0xf] }
  0x51   : > { %v3363_v24 = vor.u32 %v4342_v21, %v3360_v22  ;;  %v4329_v25 = vld [vmem:[%s5864_s2 + $0x24] sm:$0xf0]  ;;  %v4328_v26 = vld [vmem:[%s5864_s2 + $0x24] sm:$0xf]  ;;  %v3432_v27 = vld [vmem:[%s5864_s2 + $0x28] sm:$0xf0] }
  0x52   : > { %3329 = vmatmul.msk.f32.gmra.mxu1 %vm600_vm0, %v3325_v33  ;;  %3321 = vmatmul.msk.f32.gmra.mxu0 %vm600_vm0, %v597_v34  ;;  %v3431_v28 = vor.u32 %v4329_v25, %v3430_v23  ;;  %v3435_v29 = vor.u32 %v4328_v26, %v3432_v27  ;;  %v3350_v30 = vld [vmem:[%s5864_s2 + $0x80] sm:$0xf]  ;;  %v4341_v31 = vld [vmem:[%s5864_s2 + $0x84] sm:$0xf0]  ;;  %v4340_v32 = vld [vmem:[%s5864_s2 + $0x84] sm:$0xf] }
  0x53   : > { %925 = vmatpush.bf16.msrb.mxu0 %v3455_v46  ;;  %944 = vmatpush.bf16.msrb.mxu1 %v3459_v47  ;;  %v3351_v33 = vor.u32 %v4341_v31, %v3350_v30  ;;  %v3352_v34 = vld [vmem:[%s5864_s2 + $0x88] sm:$0xf0]  ;;  %v3422_v36 = vld [vmem:[%s5864_s2 + $0x10] sm:$0xf]  ;;  %v4327_v37 = vld [vmem:[%s5864_s2 + $0x14] sm:$0xf0] }
  0x54   : > { %828 = vmatpush.bf16.msra.mxu3 %v3379_v63  ;;  %810 = vmatpush.bf16.msra.mxu2 %v3367_v9  ;;  %v3355_v35 = vor.u32 %v4340_v32, %v3352_v34  ;;  %v4326_v38 = vld [vmem:[%s5864_s2 + $0x14] sm:$0xf]  ;;  %v3423_v39 = vor.u32 %v4327_v37, %v3422_v36  ;;  %v3424_v40 = vld [vmem:[%s5864_s2 + $0x18] sm:$0xf0]  ;;  %v3414_v42 = vld [vmem:[%s5864_s2] sm:$0xf] }
  0x55   : > { %v3427_v41 = vor.u32 %v4326_v38, %v3424_v40  ;;  %v4325_v43 = vld [vmem:[%s5864_s2 + $0x4] sm:$0xf0]  ;;  %v4324_v44 = vld [vmem:[%s5864_s2 + $0x4] sm:$0xf]  ;;  %v3416_v46 = vld [vmem:[%s5864_s2 + $0x8] sm:$0xf0] }
  0x56   : > { %v3415_v45 = vor.u32 %v4325_v43, %v3414_v42  ;;  %v3419_v47 = vor.u32 %v4324_v44, %v3416_v46  ;;  %v3477_v62 = vld [vmem:[%s5863_s1 + $0x48] sm:$0xff]  ;;  %v3479_v6 = vld [vmem:[%s5863_s1 + $0x58] sm:$0xf]  ;;  %v3558_v8 = vld [vmem:[%s5864_s2 + $0x170] sm:$0xf]  ;;  %s5908_s25 = sld [smem:[#allocation31_spill]] }
  0x57   : > { %926 = vmatpush.bf16.msrb.mxu0 %v3447_v58  ;;  %945 = vmatpush.bf16.msrb.mxu1 %v3451_v59  ;;  %v3565_v63 = vld [vmem:[%s5863_s1 + $0x68] sm:$0xff]  ;;  %v3567_v7 = vld [vmem:[%s5863_s1 + $0x78] sm:$0xf]  ;;  %v4370_v10 = vld [vmem:[%s5864_s2 + $0x174] sm:$0xf]  ;;  %s5910_s18 = sld [smem:[#allocation30_spill]] }
  0x58   : > { %829 = vmatpush.bf16.msra.mxu3 %v3371_v11  ;;  %811 = vmatpush.bf16.msra.mxu2 %v3359_v20  ;;  %v4371_v9 = vld [vmem:[%s5864_s2 + $0x174] sm:$0xf0]  ;;  %v3560_v12 = vld [vmem:[%s5864_s2 + $0x178] sm:$0xf0]  ;;  %v3646_v13 = vld [vmem:[%s5864_s2 + $0x1f0] sm:$0xf] }
  0x59   : > { %v3559_v11 = vor.u32 %v4371_v9, %v3558_v8  ;;  %v4387_v14 = vld [vmem:[%s5864_s2 + $0x1f4] sm:$0xf0]  ;;  %v3550_v17 = vld [vmem:[%s5864_s2 + $0x160] sm:$0xf]  ;;  %v4369_v18 = vld [vmem:[%s5864_s2 + $0x164] sm:$0xf0] }
  0x5a   : > { %3330 = vmatmul.msk.f32.gmra.mxu1 %vm600_vm0, %v3326_v60  ;;  %3322 = vmatmul.msk.f32.gmra.mxu0 %vm600_vm0, %v598_v61  ;;  %v3476_v60 = vld [vmem:[%s5863_s1 + $0x40] sm:$0xff]  ;;  %v3647_v16 = vor.u32 %v4387_v14, %v3646_v13  ;;  %v3551_v20 = vor.u32 %v4369_v18, %v3550_v17  ;;  %v3552_v21 = vld [vmem:[%s5864_s2 + $0x168] sm:$0xf0]  ;;  %v3542_v26 = vld [vmem:[%s5864_s2 + $0x150] sm:$0xf]  ;;  %s586_s27 = scalar_lea.vmem [#allocation13], %s585_s30 }
  0x5b   : > { %927 = vmatpush.bf16.msrb.mxu0 %v3439_v15  ;;  %946 = vmatpush.bf16.msrb.mxu1 %v3443_v19  ;;  %v3564_v61 = vld [vmem:[%s5863_s1 + $0x60] sm:$0xff]  ;;  %v3563_v15 = vor.u32 %v4370_v10, %v3560_v12  ;;  %v4367_v27 = vld [vmem:[%s5864_s2 + $0x154] sm:$0xf0]  ;;  %v3544_v30 = vld [vmem:[%s5864_s2 + $0x158] sm:$0xf0]  ;;  %s3185_s9 = sshll.u32 %s586_s27, 4  ;;  %s3186_s9 = int_to_ptr.vmem [resolvable:$true] %s3185_s9 }
  0x5c   : > { %830 = vmatpush.bf16.msra.mxu3 %v3363_v24  ;;  %812 = vmatpush.bf16.msra.mxu2 %v3351_v33  ;;  %v4368_v19 = vld [vmem:[%s5864_s2 + $0x164] sm:$0xf]  ;;  %v3638_v23 = vld [vmem:[%s5864_s2 + $0x1e0] sm:$0xf]  ;;  %v4385_v24 = vld [vmem:[%s5864_s2 + $0x1e4] sm:$0xf0]  ;;  %s3183_s29 = scalar_lea.hbm %s5908_s25, %s5025_s22 }
  0x5d   : > { %v3555_v22 = vor.u32 %v4368_v19, %v3552_v21  ;;  %v3639_v25 = vor.u32 %v4385_v24, %v3638_v23  ;;  %v3630_v31 = vld [vmem:[%s5864_s2 + $0x1d0] sm:$0xf]  ;;  %v4383_v32 = vld [vmem:[%s5864_s2 + $0x1d4] sm:$0xf0]  ;;  %v4365_v36 = vld [vmem:[%s5864_s2 + $0x144] sm:$0xf0] }
  0x5e   : > { %v3631_v34 = vor.u32 %v4383_v32, %v3630_v31  ;;  %v4364_v37 = vld [vmem:[%s5864_s2 + $0x144] sm:$0xf]  ;;  %v4381_v42 = vld [vmem:[%s5864_s2 + $0x1c4] sm:$0xf0]  ;;  %v3526_v44 = vld [vmem:[%s5864_s2 + $0x130] sm:$0xf] }
  0x5f   : > { %928 = vmatpush.bf16.msrb.mxu0 %v3431_v28  ;;  %947 = vmatpush.bf16.msrb.mxu1 %v3435_v29  ;;  %v4366_v28 = vld [vmem:[%s5864_s2 + $0x154] sm:$0xf]  ;;  %v3543_v29 = vor.u32 %v4367_v27, %v3542_v26  ;;  %v3598_v12 = vld [vmem:[%s5864_s2 + $0x190] sm:$0xf]  ;;  %v4375_v13 = vld [vmem:[%s5864_s2 + $0x194] sm:$0xf0] }
  0x60   : > { %831 = vmatpush.bf16.msra.mxu3 %v3355_v35  ;;  %990 = vmatpush.msrb.mxu2 %v5118_v0  ;;  %v3547_v33 = vor.u32 %v4366_v28, %v3544_v30  ;;  %v3534_v35 = vld [vmem:[%s5864_s2 + $0x140] sm:$0xf]  ;;  %v4362_v46 = vld [vmem:[%s5864_s2 + $0x134] sm:$0xf]  ;;  %v4357_v19 = vld [vmem:[%s5864_s2 + $0x104] sm:$0xf0] }
  0x61   : > { %v3535_v38 = vor.u32 %v4365_v36, %v3534_v35  ;;  %v4358_v8 = vld [vmem:[%s5864_s2 + $0x114] sm:$0xf]  ;;  %v3502_v18 = vld [vmem:[%s5864_s2 + $0x100] sm:$0xf]  ;;  %v3648_v30 = vld [vmem:[%s5864_s2 + $0x1f8] sm:$0xf0] }
  0x62   : > { %3331 = vmatmul.msk.f32.gmra.mxu1 %vm600_vm0, %v3327_v4  ;;  %3323 = vmatmul.msk.f32.gmra.mxu0 %vm600_vm0, %v599_v5  ;;  %v3478_v4 = vld [vmem:[%s5863_s1 + $0x50] sm:$0xff]  ;;  %v3503_v21 = vor.u32 %v4357_v19, %v3502_v18  ;;  %v3590_v24 = vld [vmem:[%s5864_s2 + $0x180] sm:$0xf]  ;;  %v4403_v19 = vld [vmem:[%s5864_s2 + $0x274] sm:$0xf0]  ;;  %s3187_s21 = sshll.u32 %s3183_s29, 4  ;;  %s3188_s21 = int_to_ptr.hbm [resolvable:$true] %s3187_s21 }
  0x63   : > { %929 = vmatpush.bf16.msrb.mxu0 %v3423_v39  ;;  %948 = vmatpush.bf16.msrb.mxu1 %v3427_v41  ;;  %v3566_v5 = vld [vmem:[%s5863_s1 + $0x70] sm:$0xff]  ;;  %v3536_v39 = vld [vmem:[%s5864_s2 + $0x148] sm:$0xf0]  ;;  %v3622_v41 = vld [vmem:[%s5864_s2 + $0x1c0] sm:$0xf]  ;;  %s3175_s24 = scalar_lea.sflag [#allocation4], %s585_s30 }
  0x64   : > { %991 = vmatpush.msrb.mxu2 %v5120_v1  ;;  %1106 = vmatpush.bf16.msrb.mxu3 %v3559_v11  ;;  %v3539_v40 = vor.u32 %v4364_v37, %v3536_v39  ;;  %v3623_v43 = vor.u32 %v4381_v42, %v3622_v41  ;;  %v3512_v11 = vld [vmem:[%s5864_s2 + $0x118] sm:$0xf0]  ;;  %v3734_v18 = vld [vmem:[%s5864_s2 + $0x270] sm:$0xf]  ;;  %s4848_s12 = sshra.s32 %s3188_s21, 4  ;;  %s4854_s28 = scalar_lea.hbm %s5908_s25, 2  ;;  %s4849_s12 = int_to_ptr.hbm [resolvable:$true] %s4848_s12 }
  0x65   : > { %v3515_v14 = vor.u32 %v4358_v8, %v3512_v11  ;;  %s4850_s15 = scalar_lea.hbm %s4849_s12, 1  ;;  %p4855_p3 = scmp.lt.s32.totalorder %s4849_s12, %s5908_s25 }
  0x66   : > { %992 = vmatpush.msrb.mxu2 %v5124_v2  ;;  %p4851_p0 = scmp.ne.s32.totalorder %s4849_s12, %s4850_s15  ;;  %p4856_p4 = scmp.lt.s32.totalorder %s4854_s28, %s4850_s15 }
  0x67   : > { %930 = vmatpush.bf16.msrb.mxu0 %v3415_v45  ;;  %949 = vmatpush.bf16.msrb.mxu1 %v3419_v47  ;;  %v4363_v45 = vld [vmem:[%s5864_s2 + $0x134] sm:$0xf0] }
  0x68   : > { %993 = vmatpush.msrb.mxu2 %v5127_v3  ;;  %1107 = vmatpush.bf16.msrb.mxu3 %v3551_v20  ;;  %v3527_v47 = vor.u32 %v4363_v45, %v3526_v44  ;;  %v4356_v20 = vld [vmem:[%s5864_s2 + $0x104] sm:$0xf]  ;;  %p4852_p1 = pnand %p4851_p0, %p5042_p5  ;;  %p4857_p7 = por %p4856_p4, %p4855_p3 }
  0x6a   : > { %p4853_p2 = pneg %p4852_p1 }
  0x6b   : > { %1181 = vmatpush.msra.mxu1 %v5118_v0  ;;  %1125 = vmatpush.bf16.msra.mxu0 %v3563_v15  ;;  %v3599_v15 = vor.u32 %v4375_v13, %v3598_v12  ;;  %v3652_v12 = vld [vmem:[%s5863_s1 + $0x80] sm:$0xff]  ;;  %v3653_v13 = vld [vmem:[%s5863_s1 + $0x88] sm:$0xff] }
  0x6c   : > { %1108 = vmatpush.bf16.msrb.mxu3 %v3543_v29  ;;  %v4386_v29 = vld [vmem:[%s5864_s2 + $0x1f4] sm:$0xf]  ;;  %p4858_p8 = pnand %p4857_p7, %p4853_p2 }
  0x6d   : > { %1182 = vmatpush.msra.mxu1 %v5120_v1  ;;  %v3651_v31 = vor.u32 %v4386_v29, %v3648_v30  ;;  %v3728_v30 = vld [vmem:[%s5864_s2 + $0x268] sm:$0xf0] }
  0x6f   : > { %1183 = vmatpush.msra.mxu1 %v5124_v2  ;;  %1126 = vmatpush.bf16.msra.mxu0 %v3555_v22  ;;  %v3504_v22 = vld [vmem:[%s5864_s2 + $0x108] sm:$0xf0] }
  0x70   : > { %1109 = vmatpush.bf16.msrb.mxu3 %v3535_v38  ;;  %v3507_v23 = vor.u32 %v4356_v20, %v3504_v22  ;;  %v4402_v20 = vld [vmem:[%s5864_s2 + $0x274] sm:$0xf]  ;;  %v3736_v22 = vld [vmem:[%s5864_s2 + $0x278] sm:$0xf0] }
  0x71   : > { %1184 = vmatpush.msra.mxu1 %v5127_v3 }
  0x73   : > { %1127 = vmatpush.bf16.msra.mxu0 %v3547_v33  ;;  %v4384_v33 = vld [vmem:[%s5864_s2 + $0x1e4] sm:$0xf] }
  0x74   : > { %1110 = vmatpush.bf16.msrb.mxu3 %v3527_v47 }
  0x77   : > { %1128 = vmatpush.bf16.msra.mxu0 %v3539_v40 }
  0xc7   : > { %v694_v48 = vpop.f32.mrf.mxu1  ;;  %v630_v49 = vpop.f32.mrf.mxu0 }
  0xcf   : > { %v697_v50 = vpop.f32.mrf.mxu1  ;;  %v633_v51 = vpop.f32.mrf.mxu0 }
  0xd0   : > { %v706_v52 = vpack.c.bf16 %v697_v50, %v694_v48  ;;  %v642_v53 = vpack.c.bf16 %v633_v51, %v630_v49  ;;  %v3528_v48 = vld [vmem:[%s5864_s2 + $0x138] sm:$0xf0]  ;;  %v3614_v49 = vld [vmem:[%s5864_s2 + $0x1b0] sm:$0xf]  ;;  %v4379_v50 = vld [vmem:[%s5864_s2 + $0x1b4] sm:$0xf0] }
  0xd2   : > { %813 = vmatmul.bf16.vlgmr.msra.gmra.mxu2 %v706_v52  ;;  %832 = vmatmul.bf16.vlgmr.msra.gmra.mxu3 %v706_v52 }
  0xd3   : > { %931 = vmatmul.bf16.vlgmr.msrb.gmra.mxu0 %v642_v53  ;;  %950 = vmatmul.bf16.vlgmr.msrb.gmra.mxu1 %v642_v53  ;;  %v3531_v53 = vor.u32 %v4362_v46, %v3528_v48  ;;  %v3616_v46 = vld [vmem:[%s5864_s2 + $0x1b8] sm:$0xf0] }
  0xd4   : > { %1297 = vmatpush.bf16.msra.mxu2 %v3647_v16 }
  0xd5   : > { %1129 = vmatpush.bf16.msra.mxu0 %v3531_v53  ;;  %v4374_v53 = vld [vmem:[%s5864_s2 + $0x194] sm:$0xf] }
  0xd7   : > { %v700_v54 = vpop.f32.mrf.mxu1  ;;  %v636_v55 = vpop.f32.mrf.mxu0 }
  0xd8   : > { %1298 = vmatpush.bf16.msra.mxu2 %v3639_v25  ;;  %v4373_v25 = vld [vmem:[%s5864_s2 + $0x184] sm:$0xf0] }
  0xd9   : > { %v3591_v28 = vor.u32 %v4373_v25, %v3590_v24  ;;  %v3726_v24 = vld [vmem:[%s5864_s2 + $0x260] sm:$0xf]  ;;  %v4401_v25 = vld [vmem:[%s5864_s2 + $0x264] sm:$0xf0] }
  0xda   : > { %v3727_v29 = vor.u32 %v4401_v25, %v3726_v24 }
  0xdc   : > { %1299 = vmatpush.bf16.msra.mxu2 %v3631_v34  ;;  %v3640_v34 = vld [vmem:[%s5864_s2 + $0x1e8] sm:$0xf0] }
  0xdd   : > { %v3643_v36 = vor.u32 %v4384_v33, %v3640_v34  ;;  %v4399_v33 = vld [vmem:[%s5864_s2 + $0x254] sm:$0xf0]  ;;  %v4398_v34 = vld [vmem:[%s5864_s2 + $0x254] sm:$0xf] }
  0xdf   : > { %v703_v56 = vpop.f32.mrf.mxu1  ;;  %v639_v57 = vpop.f32.mrf.mxu0 }
  0xe0   : > { %v707_v58 = vpack.c.bf16 %v703_v56, %v700_v54  ;;  %v643_v59 = vpack.c.bf16 %v639_v57, %v636_v55  ;;  %1300 = vmatpush.bf16.msra.mxu2 %v3623_v43  ;;  %v3615_v54 = vor.u32 %v4379_v50, %v3614_v49  ;;  %v3518_v55 = vld [vmem:[%s5864_s2 + $0x120] sm:$0xf]  ;;  %v4361_v56 = vld [vmem:[%s5864_s2 + $0x124] sm:$0xf0]  ;;  %v4360_v57 = vld [vmem:[%s5864_s2 + $0x124] sm:$0xf] }
  0xe1   : > { %v3624_v43 = vld [vmem:[%s5864_s2 + $0x1c8] sm:$0xf0]  ;;  %v4376_v49 = vld [vmem:[%s5864_s2 + $0x1a4] sm:$0xf] }
  0xe2   : > { %818 = vmatmul.bf16.gmra.mxu2 %v707_v58  ;;  %837 = vmatmul.bf16.gmra.mxu3 %v707_v58  ;;  %v3519_v58 = vor.u32 %v4361_v56, %v3518_v55  ;;  %v3608_v50 = vld [vmem:[%s5864_s2 + $0x1a8] sm:$0xf0] }
  0xe3   : > { %936 = vmatmul.bf16.gmra.mxu0 %v643_v59  ;;  %955 = vmatmul.bf16.gmra.mxu1 %v643_v59  ;;  %v3520_v59 = vld [vmem:[%s5864_s2 + $0x128] sm:$0xf0] }
  0xe4   : > { %1301 = vmatpush.bf16.msra.mxu2 %v3615_v54  ;;  %1111 = vmatpush.bf16.msrb.mxu3 %v3519_v58  ;;  %v3600_v54 = vld [vmem:[%s5864_s2 + $0x198] sm:$0xf0]  ;;  %v3592_v58 = vld [vmem:[%s5864_s2 + $0x188] sm:$0xf0] }
  0xe5   : > { %v3603_v56 = vor.u32 %v4374_v53, %v3600_v54  ;;  %v4393_v53 = vld [vmem:[%s5864_s2 + $0x224] sm:$0xf0]  ;;  %v4392_v54 = vld [vmem:[%s5864_s2 + $0x224] sm:$0xf] }
  0xf2   : > { %3480 = vmatmul.msk.f32.vlgmr.msrb.gmra.mxu2 %vm600_vm0, %v3476_v60  ;;  %v3523_v60 = vor.u32 %v4360_v57, %v3520_v59  ;;  %v4372_v57 = vld [vmem:[%s5864_s2 + $0x184] sm:$0xf] }
  0xf3   : > { %3568 = vmatmul.msk.f32.vlgmr.msra.gmra.mxu1 %vm600_vm0, %v3564_v61  ;;  %v3606_v61 = vld [vmem:[%s5864_s2 + $0x1a0] sm:$0xf] }
  0xf4   : > { %1130 = vmatpush.bf16.msra.mxu0 %v3523_v60 }
  0xf8   : > { %1131 = vmatpush.bf16.msra.mxu0 %v3515_v14  ;;  %v3654_v14 = vld [vmem:[%s5863_s1 + $0x90] sm:$0xff] }
  0xfa   : > { %3481 = vmatmul.msk.f32.gmra.mxu2 %vm600_vm0, %v3477_v62  ;;  %v4377_v62 = vld [vmem:[%s5864_s2 + $0x1a4] sm:$0xf0] }
  0xfb   : > { %3569 = vmatmul.msk.f32.gmra.mxu1 %vm600_vm0, %v3565_v63 }
  0xfc   : > { %1132 = vmatpush.bf16.msra.mxu0 %v3507_v23  ;;  %v3739_v23 = vor.u32 %v4402_v20, %v3736_v22 }
 0x100   : > { %1372 = vmatpush.msrb.mxu0 %v5118_v0  ;;  %v4382_v0 = vld [vmem:[%s5864_s2 + $0x1d4] sm:$0xf] }
 0x102   : > { %3482 = vmatmul.msk.f32.gmra.mxu2 %vm600_vm0, %v3478_v4  ;;  %1373 = vmatpush.msrb.mxu0 %v5120_v1  ;;  %v3632_v1 = vld [vmem:[%s5864_s2 + $0x1d8] sm:$0xf0] }
 0x103   : > { %3570 = vmatmul.msk.f32.gmra.mxu1 %vm600_vm0, %v3566_v5  ;;  %v3607_v5 = vor.u32 %v4377_v62, %v3606_v61  ;;  %v3635_v41 = vor.u32 %v4382_v0, %v3632_v1  ;;  %v3595_v61 = vor.u32 %v4372_v57, %v3592_v58  ;;  %v4397_v0 = vld [vmem:[%s5864_s2 + $0x244] sm:$0xf0]  ;;  %v4396_v1 = vld [vmem:[%s5864_s2 + $0x244] sm:$0xf] }
 0x104   : > { %1374 = vmatpush.msrb.mxu0 %v5124_v2  ;;  %v4380_v2 = vld [vmem:[%s5864_s2 + $0x1c4] sm:$0xf] }
 0x105   : > { %1302 = vmatpush.bf16.msra.mxu2 %v3607_v5  ;;  %v3627_v44 = vor.u32 %v4380_v2, %v3624_v43  ;;  %v3712_v2 = vld [vmem:[%s5864_s2 + $0x248] sm:$0xf0] }
 0x106   : > { %1375 = vmatpush.msrb.mxu0 %v5127_v3  ;;  %v4378_v3 = vld [vmem:[%s5864_s2 + $0x1b4] sm:$0xf]  ;;  %v3715_v43 = vor.u32 %v4396_v1, %v3712_v2 }
 0x107   : > { %v3619_v47 = vor.u32 %v4378_v3, %v3616_v46  ;;  %v3702_v3 = vld [vmem:[%s5864_s2 + $0x230] sm:$0xf]  ;;  %v4395_v46 = vld [vmem:[%s5864_s2 + $0x234] sm:$0xf0] }
 0x109   : > { %1303 = vmatpush.bf16.msra.mxu2 %v3599_v15  ;;  %v3655_v15 = vld [vmem:[%s5863_s1 + $0x98] sm:$0xf] }
 0x10a   : > { %3483 = vmatmul.msk.f32.gmra.mxu2 %vm600_vm0, %v3479_v6  ;;  %v3510_v6 = vld [vmem:[%s5864_s2 + $0x110] sm:$0xf] }
 0x10b   : > { %3571 = vmatmul.msk.f32.gmra.mxu1 %vm600_vm0, %v3567_v7  ;;  %v4359_v7 = vld [vmem:[%s5864_s2 + $0x114] sm:$0xf0] }
 0x10c   : > { %v3511_v10 = vor.u32 %v4359_v7, %v3510_v6 }
 0x10d   : > { %1304 = vmatpush.bf16.msra.mxu2 %v3591_v28  ;;  %v4400_v28 = vld [vmem:[%s5864_s2 + $0x264] sm:$0xf] }
 0x10e   : > { %1112 = vmatpush.bf16.msrb.mxu3 %v3511_v10 }
 0x111   : > { %1507 = vmatpush.bf16.msrb.mxu2 %v3739_v23 }
 0x112   : > { %1113 = vmatpush.bf16.msrb.mxu3 %v3503_v21  ;;  %v3735_v21 = vor.u32 %v4403_v19, %v3734_v18 }
 0x114   : > { %4540 = vmatpush.bf16.msrb.mxu1 %v3735_v21 }
 0x116   : > { %1316 = vmatpush.bf16.msra.mxu3 %v3651_v31  ;;  %v3731_v31 = vor.u32 %v4400_v28, %v3728_v30 }
 0x118   : > { %4541 = vmatpush.bf16.msrb.mxu1 %v3727_v29  ;;  %1508 = vmatpush.bf16.msrb.mxu2 %v3731_v31 }
 0x11a   : > { %1317 = vmatpush.bf16.msra.mxu3 %v3643_v36  ;;  %v3720_v36 = vld [vmem:[%s5864_s2 + $0x258] sm:$0xf0] }
 0x11e   : > { %1318 = vmatpush.bf16.msra.mxu3 %v3635_v41 }
 0x122   : > { %1319 = vmatpush.bf16.msra.mxu3 %v3627_v44 }
 0x126   : > { %1320 = vmatpush.bf16.msra.mxu3 %v3619_v47  ;;  %v4394_v47 = vld [vmem:[%s5864_s2 + $0x234] sm:$0xf] }
 0x150   : > { %v5488_v51 = vpop.f32.mrf.mxu0  ;;  %v951_v52 = vpop.f32.mrf.mxu1 }
 0x155   : > { %v5508_v63 = vpop.f32.mrf.mxu2  ;;  %v833_v4 = vpop.f32.mrf.mxu3 }
 0x156   : > { %v5519_v9 = vadd.f32 %v951_v52, %v833_v4  ;;  %v3611_v52 = vor.u32 %v4376_v49, %v3608_v50  ;;  %v3704_v49 = vld [vmem:[%s5864_s2 + $0x238] sm:$0xf0] }
 0x157   : > { %v3707_v50 = vor.u32 %v4394_v47, %v3704_v49  ;;  %v933_v49 = vadd.f32 %v5488_v51, %v5508_v63 }
 0x158   : > { %v5530_v16 = vpop.f32.mrf.mxu1  ;;  %v5532_v17 = vpop.f32.mrf.mxu0  ;;  %1321 = vmatpush.bf16.msra.mxu3 %v3611_v52  ;;  %v3694_v52 = vld [vmem:[%s5864_s2 + $0x220] sm:$0xf] }
 0x15c   : > { %1322 = vmatpush.bf16.msra.mxu3 %v3603_v56  ;;  %v3696_v56 = vld [vmem:[%s5864_s2 + $0x228] sm:$0xf0] }
 0x15d   : > { %v5552_v26 = vpop.f32.mrf.mxu2  ;;  %v5554_v27 = vpop.f32.mrf.mxu3  ;;  %v3699_v57 = vor.u32 %v4392_v54, %v3696_v56 }
 0x160   : > { %v956_v32 = vpop.f32.mrf.mxu1  ;;  %v937_v35 = vpop.f32.mrf.mxu0  ;;  %1323 = vmatpush.bf16.msra.mxu3 %v3595_v61  ;;  %v4391_v61 = vld [vmem:[%s5864_s2 + $0x214] sm:$0xf0] }
 0x165   : > { %v819_v37 = vpop.f32.mrf.mxu2  ;;  %v838_v38 = vpop.f32.mrf.mxu3 }
 0x166   : > { %v5578_v39 = vadd.f32 %v937_v35, %v819_v37  ;;  %v5580_v40 = vadd.f32 %v956_v32, %v838_v38  ;;  %v3718_v32 = vld [vmem:[%s5864_s2 + $0x250] sm:$0xf]  ;;  %v3723_v37 = vor.u32 %v4398_v34, %v3720_v36  ;;  %v3710_v38 = vld [vmem:[%s5864_s2 + $0x240] sm:$0xf] }
 0x167   : > { %v3719_v35 = vor.u32 %v4399_v33, %v3718_v32  ;;  %v3711_v41 = vor.u32 %v4397_v0, %v3710_v38 }
 0x168   : > { %v5582_v42 = vpop.f32.mrf.mxu1  ;;  %1509 = vmatpush.bf16.msrb.mxu2 %v3723_v37  ;;  %v5680_v44 = vpop.f32.mrf.mxu0 }
 0x169   : > { %4542 = vmatpush.bf16.msrb.mxu1 %v3719_v35 }
 0x16c   : > { %1510 = vmatpush.bf16.msrb.mxu2 %v3715_v43 }
 0x16d   : > { %v5590_v45 = vpop.f32.mrf.mxu2  ;;  %4543 = vmatpush.bf16.msrb.mxu1 %v3711_v41  ;;  %v840_v20 = vpop.f32.mrf.mxu3 }
 0x16e   : > { %v940_v43 = vadd.f32 %v5680_v44, %v5590_v45 }
 0x170   : > { %v1186_v48 = vpop.f32.mrf.mxu1  ;;  %1511 = vmatpush.bf16.msrb.mxu2 %v3707_v50 }
 0x174   : > { %1512 = vmatpush.bf16.msrb.mxu2 %v3699_v57 }
 0x175   : > { %v995_v55 = vpop.f32.mrf.mxu2 }
 0x178   : > { %v1189_v59 = vpop.f32.mrf.mxu1 }
 0x179   : > { %v1198_v60 = vpack.c.bf16 %v1189_v59, %v1186_v48  ;;  %v3703_v48 = vor.u32 %v4395_v46, %v3702_v3  ;;  %v935_v46 = vadd.f32 %v5532_v17, %v5552_v26 }
 0x17b   : > { %1305 = vmatmul.bf16.vlgmr.msra.gmra.mxu2 %v1198_v60  ;;  %4544 = vmatpush.bf16.msrb.mxu1 %v3703_v48 }
 0x17d   : > { %v998_v62 = vpop.f32.mrf.mxu2 }
 0x17e   : > { %v1007_v4 = vpack.c.bf16 %v998_v62, %v995_v55  ;;  %v3695_v55 = vor.u32 %v4393_v53, %v3694_v52  ;;  %v4390_v62 = vld [vmem:[%s5864_s2 + $0x214] sm:$0xf] }
 0x180   : > { %1114 = vmatmul.bf16.vlgmr.msrb.gmra.mxu3 %v1007_v4  ;;  %1133 = vmatmul.bf16.vlgmr.msra.gmra.mxu0 %v1007_v4  ;;  %v1192_v5 = vpop.f32.mrf.mxu1 }
 0x181   : > { %1488 = vmatpush.bf16.msra.mxu0 %v3735_v21  ;;  %4545 = vmatpush.bf16.msrb.mxu1 %v3695_v55  ;;  %v959_v21 = vadd.f32 %v5582_v42, %v840_v20  ;;  %v4431_v20 = vld [vmem:[#allocation5 + $0xd4] sm:$0xf0] }
 0x185   : > { %v1001_v6 = vpop.f32.mrf.mxu2  ;;  %1489 = vmatpush.bf16.msra.mxu0 %v3727_v29 }
 0x188   : > { %v1195_v7 = vpop.f32.mrf.mxu1 }
 0x189   : > { %v1199_v8 = vpack.c.bf16 %v1195_v7, %v1192_v5  ;;  %1490 = vmatpush.bf16.msra.mxu0 %v3719_v35  ;;  %v3688_v5 = vld [vmem:[%s5864_s2 + $0x218] sm:$0xf0]  ;;  %v4389_v7 = vld [vmem:[%s5864_s2 + $0x204] sm:$0xf0] }
 0x18b   : > { %1310 = vmatmul.bf16.gmra.mxu2 %v1199_v8 }
 0x18d   : > { %v1004_v10 = vpop.f32.mrf.mxu2  ;;  %1491 = vmatpush.bf16.msra.mxu0 %v3711_v41 }
 0x18e   : > { %v1008_v11 = vpack.c.bf16 %v1004_v10, %v1001_v6  ;;  %v3678_v6 = vld [vmem:[%s5864_s2 + $0x200] sm:$0xf] }
 0x18f   : > { %v3679_v10 = vor.u32 %v4389_v7, %v3678_v6 }
 0x190   : > { %1119 = vmatmul.bf16.gmra.mxu3 %v1008_v11  ;;  %1138 = vmatmul.bf16.gmra.mxu0 %v1008_v11  ;;  %v3680_v11 = vld [vmem:[%s5864_s2 + $0x208] sm:$0xf0] }
 0x191   : > { %1492 = vmatpush.bf16.msra.mxu0 %v3703_v48 }
 0x195   : > { %1493 = vmatpush.bf16.msra.mxu0 %v3695_v55 }
 0x1a0   : > { %1324 = vmatmul.bf16.vlgmr.msra.gmra.mxu3 %v1198_v60  ;;  %3656 = vmatmul.msk.f32.vlgmr.msrb.gmra.mxu0 %vm600_vm0, %v3652_v12  ;;  %v3686_v60 = vld [vmem:[%s5864_s2 + $0x210] sm:$0xf]  ;;  %v954_v12 = vadd.f32 %v5530_v16, %v5554_v27 }
 0x1a1   : > { %v3687_v4 = vor.u32 %v4391_v61, %v3686_v60 }
 0x1a3   : > { %1494 = vmatpush.bf16.msra.mxu0 %v3687_v4  ;;  %4546 = vmatpush.bf16.msrb.mxu1 %v3687_v4 }
 0x1a7   : > { %1495 = vmatpush.bf16.msra.mxu0 %v3679_v10  ;;  %4547 = vmatpush.bf16.msrb.mxu1 %v3679_v10  ;;  %v1535_v10 = vld [vmem:[%s5865_s3 + $0x8] sm:$0x3f] }
 0x1a8   : > { %3657 = vmatmul.msk.f32.gmra.mxu0 %vm600_vm0, %v3653_v13 }
 0x1b0   : > { %1329 = vmatmul.bf16.gmra.mxu3 %v1199_v8  ;;  %3658 = vmatmul.msk.f32.gmra.mxu0 %vm600_vm0, %v3654_v14  ;;  %v4388_v8 = vld [vmem:[%s5864_s2 + $0x204] sm:$0xf] }
 0x1b1   : > { %v3683_v13 = vor.u32 %v4388_v8, %v3680_v11  ;;  %v3818_v11 = vld [vmem:[#allocation5 + $0xf0] sm:$0xf] }
 0x1b8   : > { %3659 = vmatmul.msk.f32.gmra.mxu0 %vm600_vm0, %v3655_v15 }
 0x1fd   : > { %v1134_v58 = vpop.f32.mrf.mxu0 }
 0x1fe   : > { %v5707_v59 = vadd.f32 %v1134_v58, %v5519_v9  ;;  %v3691_v9 = vor.u32 %v4390_v62, %v3688_v5  ;;  %v1306_v32 = vpop.f32.mrf.mxu2  ;;  %v1534_v62 = vld [vmem:[%s5865_s3] sm:$0xff] }
 0x200   : > { %1513 = vmatpush.bf16.msrb.mxu2 %v3691_v9  ;;  %v3746_v9 = vld [vmem:[%s5865_s3 + $0x10] sm:$0xff] }
 0x203   : > { %v1115_v30 = vpop.f32.mrf.mxu3 }
 0x204   : > { %1514 = vmatpush.bf16.msrb.mxu2 %v3683_v13  ;;  %v1144_v54 = vadd.f32 %v1115_v30, %v933_v49 }
 0x205   : > { %v1136_v14 = vpop.f32.mrf.mxu0 }
 0x206   : > { %v5735_v15 = vadd.f32 %v1136_v14, %v954_v12  ;;  %v1335_v17 = vadd.f32 %v1306_v32, %v1144_v54  ;;  %v4435_v12 = vld [vmem:[#allocation5 + $0xf4] sm:$0xf0]  ;;  %v3810_v14 = vld [vmem:[#allocation5 + $0xe0] sm:$0xf]  ;;  %v3882_v54 = vld [vmem:[#allocation5 + $0x70] sm:$0xf] }
 0x207   : > { %v3819_v13 = vor.u32 %v4435_v12, %v3818_v11  ;;  %v4423_v32 = vld [vmem:[#allocation5 + $0x94] sm:$0xf0]  ;;  %v4430_v11 = vld [vmem:[#allocation5 + $0xd4] sm:$0xf]  ;;  %v3804_v12 = vld [vmem:[#allocation5 + $0xd8] sm:$0xf0] }
 0x209   : > { %1848 = vmatpush.bf16.msra.mxu2 %v3819_v13  ;;  %v1720_v13 = vld [vmem:[#allocation2 + $0x18] sm:$0x3] }
 0x20b   : > { %v1117_v31 = vpop.f32.mrf.mxu3 }
 0x20c   : > { %v1146_v50 = vadd.f32 %v1117_v31, %v935_v46  ;;  %v3770_v31 = vld [vmem:[#allocation5 + $0x90] sm:$0xf] }
 0x20d   : > { %v1139_v18 = vpop.f32.mrf.mxu0 }
 0x20e   : > { %v1149_v19 = vadd.f32 %v1139_v18, %v5580_v40  ;;  %v1308_v40 = vpop.f32.mrf.mxu2 }
 0x20f   : > { %v1337_v45 = vadd.f32 %v1308_v40, %v1146_v50  ;;  %v3762_v40 = vld [vmem:[#allocation5 + $0x80] sm:$0xf] }
 0x213   : > { %v1120_v33 = vpop.f32.mrf.mxu3 }
 0x214   : > { %v1148_v47 = vadd.f32 %v1120_v33, %v5578_v39  ;;  %v3771_v33 = vor.u32 %v4423_v32, %v3770_v31  ;;  %v3860_v31 = vld [vmem:[#allocation5 + $0x48] sm:$0xf0] }
 0x215   : > { %v1141_v22 = vpop.f32.mrf.mxu0 }
 0x216   : > { %v1151_v23 = vadd.f32 %v1141_v22, %v959_v21  ;;  %v1311_v35 = vpop.f32.mrf.mxu2  ;;  %v3794_v22 = vld [vmem:[#allocation5 + $0xc0] sm:$0xf] }
 0x217   : > { %v1339_v55 = vadd.f32 %v1311_v35, %v1148_v47  ;;  %v4652_v47 = vld [vmem:[%s5866_s4] ss:$0 sm:$0xff] }
 0x21b   : > { %v1122_v34 = vpop.f32.mrf.mxu3 }
 0x21c   : > { %v1150_v3 = vadd.f32 %v1122_v34, %v940_v43  ;;  %v4421_v34 = vld [vmem:[#allocation5 + $0x84] sm:$0xf0] }
 0x21d   : > { %v1377_v24 = vpop.f32.mrf.mxu0  ;;  %v3763_v35 = vor.u32 %v4421_v34, %v3762_v40  ;;  %v3788_v40 = vld [vmem:[#allocation5 + $0xb8] sm:$0xf0] }
 0x21e   : > { %v1313_v36 = vpop.f32.mrf.mxu2 }
 0x21f   : > { %v1341_v52 = vadd.f32 %v1313_v36, %v1150_v3 }
 0x223   : > { %v1325_v42 = vpop.f32.mrf.mxu3 }
 0x224   : > { %v1336_v6 = vadd.f32 %v1325_v42, %v5707_v59  ;;  %v3747_v59 = vld [vmem:[%s5865_s3 + $0x18] sm:$0x3f] }
 0x225   : > { %v1380_v25 = vpop.f32.mrf.mxu0 }
 0x226   : > { %v1389_v28 = vpack.c.bf16 %v1380_v25, %v1377_v24  ;;  %v3786_v25 = vld [vmem:[#allocation5 + $0xb0] sm:$0xf] }
 0x228   : > { %1496 = vmatmul.bf16.vlgmr.msra.gmra.mxu0 %v1389_v28  ;;  %1515 = vmatmul.bf16.vlgmr.msrb.gmra.mxu2 %v1389_v28  ;;  %v4427_v28 = vld [vmem:[#allocation5 + $0xb4] sm:$0xf0] }
 0x22b   : > { %v1327_v37 = vpop.f32.mrf.mxu3 }
 0x22c   : > { %v1338_v4 = vadd.f32 %v1327_v37, %v5735_v15  ;;  %v4433_v15 = vld [vmem:[#allocation5 + $0xe4] sm:$0xf0] }
 0x22d   : > { %v1383_v16 = vpop.f32.mrf.mxu0  ;;  %v3811_v18 = vor.u32 %v4433_v15, %v3810_v14  ;;  %v3858_v15 = vld [vmem:[#allocation5 + $0x40] sm:$0xf] }
 0x22f   : > { %1849 = vmatpush.bf16.msra.mxu2 %v3811_v18 }
 0x233   : > { %v1330_v1 = vpop.f32.mrf.mxu3 }
 0x234   : > { %v1340_v63 = vadd.f32 %v1330_v1, %v1149_v19  ;;  %v3802_v19 = vld [vmem:[#allocation5 + $0xd0] sm:$0xf] }
 0x235   : > { %v1386_v27 = vpop.f32.mrf.mxu0  ;;  %v3803_v21 = vor.u32 %v4431_v20, %v3802_v19  ;;  %v4413_v19 = vld [vmem:[#allocation5 + $0x44] sm:$0xf0]  ;;  %v4414_v20 = vld [vmem:[#allocation5 + $0x54] sm:$0xf] }
 0x236   : > { %v1390_v29 = vpack.c.bf16 %v1386_v27, %v1383_v16  ;;  %v3787_v16 = vor.u32 %v4427_v28, %v3786_v25  ;;  %v3778_v27 = vld [vmem:[#allocation5 + $0xa0] sm:$0xf]  ;;  %v3796_v25 = vld [vmem:[#allocation5 + $0xc8] sm:$0xf0]  ;;  %v3859_v28 = vor.u32 %v4413_v19, %v3858_v15  ;;  %v4450_v15 = vld [vmem:[#allocation5 + $0x174] sm:$0xf] }
 0x237   : > { %1850 = vmatpush.bf16.msra.mxu2 %v3803_v21  ;;  %v3868_v21 = vld [vmem:[#allocation5 + $0x58] sm:$0xf0] }
 0x238   : > { %1501 = vmatmul.bf16.vlgmr.msrb.gmra.mxu1 %v1390_v29  ;;  %1520 = vmatmul.bf16.gmra.mxu2 %v1390_v29  ;;  %v4425_v29 = vld [vmem:[#allocation5 + $0xa4] sm:$0xf0] }
 0x239   : > { %v3779_v30 = vor.u32 %v4425_v29, %v3778_v27  ;;  %v3871_v27 = vor.u32 %v4414_v20, %v3868_v21  ;;  %v4411_v29 = vld [vmem:[#allocation5 + $0x34] sm:$0xf0]  ;;  %v3933_v21 = vld [vmem:[#allocation5 + $0x150] sm:$0xf] }
 0x23b   : > { %v1332_v57 = vpop.f32.mrf.mxu3 }
 0x23c   : > { %v1342_v26 = vadd.f32 %v1332_v57, %v1151_v23  ;;  %v4429_v23 = vld [vmem:[#allocation5 + $0xc4] sm:$0xf0] }
 0x23d   : > { %v3795_v24 = vor.u32 %v4429_v23, %v3794_v22  ;;  %v1666_v22 = vld [vmem:[#allocation2 + $0x8] sm:$0x3]  ;;  %v3807_v23 = vor.u32 %v4430_v11, %v3804_v12  ;;  %v3941_v11 = vld [vmem:[#allocation5 + $0x160] sm:$0xf]  ;;  %v4449_v12 = vld [vmem:[#allocation5 + $0x164] sm:$0xf0] }
 0x23e   : > { %v3942_v19 = vor.u32 %v4449_v12, %v3941_v11  ;;  %v4461_v11 = vld [vmem:[#allocation5 + $0x1c4] sm:$0xf0]  ;;  %v4460_v12 = vld [vmem:[#allocation5 + $0x1c4] sm:$0xf] }
 0x23f   : > { %1851 = vmatpush.bf16.msra.mxu2 %v3795_v24  ;;  %v4428_v24 = vld [vmem:[#allocation5 + $0xc4] sm:$0xf] }
 0x240   : > { %v3799_v32 = vor.u32 %v4428_v24, %v3796_v25  ;;  %v3925_v24 = vld [vmem:[#allocation5 + $0x140] sm:$0xf]  ;;  %v4445_v25 = vld [vmem:[#allocation5 + $0x144] sm:$0xf0] }
 0x243   : > { %1852 = vmatpush.bf16.msra.mxu2 %v3787_v16  ;;  %v3850_v16 = vld [vmem:[#allocation5 + $0x30] sm:$0xf] }
 0x244   : > { %v3851_v34 = vor.u32 %v4411_v29, %v3850_v16  ;;  %v3917_v16 = vld [vmem:[#allocation5 + $0x130] sm:$0xf] }
 0x245   : > { %v1985_v29 = vld [vmem:[#allocation2 + $0x20] sm:$0xff] }
 0x247   : > { %1853 = vmatpush.bf16.msra.mxu2 %v3779_v30  ;;  %v4412_v30 = vld [vmem:[#allocation5 + $0x44] sm:$0xf] }
 0x24b   : > { %1854 = vmatpush.bf16.msra.mxu2 %v3771_v33  ;;  %v4426_v33 = vld [vmem:[#allocation5 + $0xb4] sm:$0xf] }
 0x24f   : > { %1855 = vmatpush.bf16.msra.mxu2 %v3763_v35  ;;  %v3863_v35 = vor.u32 %v4412_v30, %v3860_v31  ;;  %v3909_v31 = vld [vmem:[#allocation5 + $0x120] sm:$0xf] }
 0x2a5   : > { %v1497_v41 = vpop.f32.mrf.mxu0 }
 0x2a6   : > { %v1526_v60 = vadd.f32 %v1497_v41, %v1335_v17  ;;  %v4417_v17 = vld [vmem:[#allocation5 + $0x64] sm:$0xf0] }
 0x2ab   : > { %v1516_v38 = vpop.f32.mrf.mxu2 }
 0x2ac   : > { %v1527_v8 = vadd.f32 %v1516_v38, %v1336_v6  ;;  %v4415_v6 = vld [vmem:[#allocation5 + $0x54] sm:$0xf0] }
 0x2ad   : > { %v1499_v58 = vpop.f32.mrf.mxu0 }
 0x2ae   : > { %v1528_v39 = vadd.f32 %v1499_v58, %v1337_v45  ;;  %v1719_v58 = vld [vmem:[#allocation2 + $0x10] sm:$0xff] }
 0x2b3   : > { %v1518_v0 = vpop.f32.mrf.mxu2 }
 0x2b4   : > { %v1529_v7 = vadd.f32 %v1518_v0, %v1338_v4  ;;  %v4418_v4 = vld [vmem:[#allocation5 + $0x74] sm:$0xf] }
 0x2b5   : > { %v1502_v2 = vpop.f32.mrf.mxu1 }
 0x2b6   : > { %v1530_v44 = vadd.f32 %v1502_v2, %v1339_v55  ;;  %v4419_v55 = vld [vmem:[#allocation5 + $0x74] sm:$0xf0] }
 0x2b7   : > { %v3883_v45 = vor.u32 %v4419_v55, %v3882_v54  ;;  %v3772_v54 = vld [vmem:[#allocation5 + $0x98] sm:$0xf0] }
 0x2bb   : > { %v1521_v48 = vpop.f32.mrf.mxu2 }
 0x2bc   : > { %v1531_v5 = vadd.f32 %v1521_v48, %v1340_v63  ;;  %v4432_v63 = vld [vmem:[#allocation5 + $0xe4] sm:$0xf] }
 0x2bd   : > { %v1504_v53 = vpop.f32.mrf.mxu1 }
 0x2be   : > { %v1532_v56 = vadd.f32 %v1504_v53, %v1341_v52 }
 0x2c0   : > { %3740 = vmatpush.msk.msrb.mxu3 %vm1543_vm1, %v1532_v56  ;;  %3748 = vmatpush.msk.msra.mxu1 %vm1543_vm1, %v1532_v56 }
 0x2c2   : > { %1563 = vmatpush.msrb.mxu3 %v1530_v44  ;;  %1618 = vmatpush.msra.mxu1 %v1530_v44  ;;  %v3874_v44 = vld [vmem:[#allocation5 + $0x60] sm:$0xf] }
 0x2c3   : > { %v1523_v51 = vpop.f32.mrf.mxu2 }
 0x2c4   : > { %v1533_v61 = vadd.f32 %v1523_v51, %v1342_v26  ;;  %1564 = vmatpush.msrb.mxu3 %v1528_v39  ;;  %1619 = vmatpush.msra.mxu1 %v1528_v39  ;;  %v1665_v26 = vld [vmem:[#allocation2] sm:$0xff]  ;;  %v3820_v51 = vld [vmem:[#allocation5 + $0xf8] sm:$0xf0] }
 0x2c5   : > { %v4434_v39 = vld [vmem:[#allocation5 + $0xf4] sm:$0xf] }
 0x2c6   : > { %1565 = vmatpush.msrb.mxu3 %v1526_v60  ;;  %3743 = vmatpush.msk.msrb.mxu0 %vm1543_vm1, %v1533_v61 }
 0x2c7   : > { %1620 = vmatpush.msra.mxu1 %v1526_v60  ;;  %3741 = vmatmul.msk.f32.vlgmr.msrb.gmra.mxu3 %vm1536_vm2, %v1534_v62  ;;  %v3875_v60 = vor.u32 %v4417_v17, %v3874_v44  ;;  %v4420_v17 = vld [vmem:[#allocation5 + $0x84] sm:$0xf] }
 0x2c8   : > { %3751 = vmatpush.msk.msra.mxu3 %vm1543_vm1, %v1533_v61  ;;  %1586 = vmatpush.msrb.mxu0 %v1531_v5  ;;  %v3823_v61 = vor.u32 %v4434_v39, %v3820_v51  ;;  %v4406_v51 = vld [vmem:[#allocation5 + $0x14] sm:$0xf] }
 0x2c9   : > { %3749 = vmatmul.msk.f32.vlgmr.msra.gmra.mxu1 %vm1536_vm2, %v3746_v9 }
 0x2ca   : > { %1641 = vmatpush.msra.mxu3 %v1531_v5  ;;  %1587 = vmatpush.msrb.mxu0 %v1529_v7  ;;  %v3884_v5 = vld [vmem:[#allocation5 + $0x78] sm:$0xf0] }
 0x2cc   : > { %1642 = vmatpush.msra.mxu3 %v1529_v7  ;;  %1588 = vmatpush.msrb.mxu0 %v1527_v8  ;;  %v3887_v7 = vor.u32 %v4418_v4, %v3884_v5 }
 0x2cd   : > { %3744 = vmatmul.msk.f32.vlgmr.msrb.gmra.mxu0 %vm1536_vm2, %v1534_v62  ;;  %v3812_v62 = vld [vmem:[#allocation5 + $0xe8] sm:$0xf0] }
 0x2ce   : > { %1643 = vmatpush.msra.mxu3 %v1527_v8  ;;  %v4416_v8 = vld [vmem:[#allocation5 + $0x64] sm:$0xf] }
 0x2cf   : > { %3742 = vmatmul.msk.f32.gmra.mxu3 %vm1536_vm2, %v1535_v10 }
 0x2d0   : > { %1862 = vmatpush.bf16.msrb.mxu3 %v3823_v61  ;;  %v4404_v61 = vld [vmem:[#allocation5 + $0x4] sm:$0xf] }
 0x2d1   : > { %3750 = vmatmul.msk.f32.gmra.mxu1 %vm1536_vm2, %v3747_v59 }
 0x2d5   : > { %3745 = vmatmul.msk.f32.gmra.mxu0 %vm1536_vm2, %v1535_v10  ;;  %v3815_v10 = vor.u32 %v4432_v63, %v3812_v62  ;;  %v3836_v63 = vld [vmem:[#allocation5 + $0x18] sm:$0xf0]  ;;  %v3828_v62 = vld [vmem:[#allocation5 + $0x8] sm:$0xf0] }
 0x2d6   : > { %v3831_v4 = vor.u32 %v4404_v61, %v3828_v62  ;;  %v4463_v62 = vld [vmem:[#allocation5 + $0x1d4] sm:$0xf0] }
 0x2d7   : > { %3752 = vmatmul.msk.f32.vlgmr.msra.gmra.mxu3 %vm1536_vm2, %v3746_v9  ;;  %v3866_v9 = vld [vmem:[#allocation5 + $0x50] sm:$0xf] }
 0x2d8   : > { %v3867_v14 = vor.u32 %v4415_v6, %v3866_v9  ;;  %1863 = vmatpush.bf16.msrb.mxu3 %v3815_v10  ;;  %v3949_v6 = vld [vmem:[#allocation5 + $0x170] sm:$0xf] }
 0x2dc   : > { %1864 = vmatpush.bf16.msrb.mxu3 %v3807_v23 }
 0x2df   : > { %3753 = vmatmul.msk.f32.gmra.mxu3 %vm1536_vm2, %v3747_v59  ;;  %v3876_v59 = vld [vmem:[#allocation5 + $0x68] sm:$0xf0] }
 0x2e0   : > { %v3879_v18 = vor.u32 %v4416_v8, %v3876_v59  ;;  %1865 = vmatpush.bf16.msrb.mxu3 %v3799_v32  ;;  %v4441_v32 = vld [vmem:[#allocation5 + $0x124] sm:$0xf0] }
 0x346   : > { %v1622_v37 = vpop.f32.mrf.mxu1 }
 0x34a   : > { %v1567_v42 = vpop.f32.mrf.mxu3  ;;  %v1590_v38 = vpop.f32.mrf.mxu0 }
 0x34b   : > { %v1651_v43 = vmax.f32 %v1567_v42, %v1622_v37  ;;  %v3842_v42 = vld [vmem:[#allocation5 + $0x20] sm:$0xf]  ;;  %v3791_v37 = vor.u32 %v4426_v33, %v3788_v40  ;;  %v3910_v40 = vor.u32 %v4441_v32, %v3909_v31  ;;  %v4457_v31 = vld [vmem:[#allocation5 + $0x1a4] sm:$0xf0]  ;;  %v4456_v32 = vld [vmem:[#allocation5 + $0x1a4] sm:$0xf] }
 0x34c   : > { %v2147_v33 = vld [vmem:[#allocation2 + $0x30] sm:$0xff] }
 0x34d   : > { %1866 = vmatpush.bf16.msrb.mxu3 %v3791_v37  ;;  %v3893_v37 = vld [vmem:[#allocation5 + $0x100] sm:$0xf] }
 0x34e   : > { %v1625_v41 = vpop.f32.mrf.mxu1 }
 0x352   : > { %v1570_v36 = vpop.f32.mrf.mxu3  ;;  %v1593_v2 = vpop.f32.mrf.mxu0 }
 0x353   : > { %v1653_v48 = vmax.f32 %v1570_v36, %v1625_v41  ;;  %v4409_v36 = vld [vmem:[#allocation5 + $0x24] sm:$0xf0] }
 0x35a   : > { %v1645_v0 = vpop.f32.mrf.mxu3 }
 0x35b   : > { %v1652_v1 = vmax.f32 %v1590_v38, %v1645_v0  ;;  %v3843_v38 = vor.u32 %v4409_v36, %v3842_v42  ;;  %v3834_v0 = vld [vmem:[#allocation5 + $0x10] sm:$0xf]  ;;  %v1986_v42 = vld [vmem:[#allocation2 + $0x28] sm:$0x3] }
 0x35d   : > { %v1655_v46 = vmax.f32 %v1651_v43, %v1652_v1  ;;  %v4407_v1 = vld [vmem:[#allocation5 + $0x14] sm:$0xf0]  ;;  %v4405_v43 = vld [vmem:[#allocation5 + $0x4] sm:$0xf0] }
 0x35e   : > { %v3835_v41 = vor.u32 %v4407_v1, %v3834_v0  ;;  %v2148_v0 = vld [vmem:[#allocation2 + $0x38] sm:$0x3] }
 0x35f   : > { %v1661_v52 = vadd.f32 %v4652_v47, %v1655_v46  ;;  %v4424_v46 = vld [vmem:[#allocation5 + $0xa4] sm:$0xf] }
 0x361   : > { %v5777_v57 = vmax.f32 %v1661_v52, 0.0  ;;  %v4422_v52 = vld [vmem:[#allocation5 + $0x94] sm:$0xf] }
 0x362   : > { %v1648_v3 = vpop.f32.mrf.mxu3  ;;  %v3775_v55 = vor.u32 %v4422_v52, %v3772_v54  ;;  %v4018_v52 = vld [vmem:[#allocation5 + $0x1f8] sm:$0xf0] }
 0x363   : > { %v1654_v49 = vmax.f32 %v1593_v2, %v1648_v3  ;;  %v3826_v2 = vld [vmem:[#allocation5] sm:$0xf] }
 0x364   : > { %v3827_v3 = vor.u32 %v4405_v43, %v3826_v2  ;;  %v3943_v2 = vld [vmem:[#allocation5 + $0x168] sm:$0xf0] }
 0x365   : > { %v1656_v50 = vmax.f32 %v1653_v48, %v1654_v49  ;;  %v4410_v49 = vld [vmem:[#allocation5 + $0x34] sm:$0xf] }
 0x367   : > { %v1662_v53 = vadd.f32 %v4652_v47, %v1656_v50  ;;  %v3780_v47 = vld [vmem:[#allocation5 + $0xa8] sm:$0xf0]  ;;  %v3852_v50 = vld [vmem:[#allocation5 + $0x38] sm:$0xf0] }
 0x368   : > { %v3783_v48 = vor.u32 %v4424_v46, %v3780_v47  ;;  %v3935_v46 = vld [vmem:[#allocation5 + $0x158] sm:$0xf0]  ;;  %v4016_v47 = vld [vmem:[#allocation5 + $0x1f0] sm:$0xf] }
 0x369   : > { %v5775_v56 = vmax.f32 %v1662_v53, 0.0  ;;  %v3855_v53 = vor.u32 %v4410_v49, %v3852_v50  ;;  %v4467_v49 = vld [vmem:[#allocation5 + $0x1f4] sm:$0xf0]  ;;  %v4466_v50 = vld [vmem:[#allocation5 + $0x1f4] sm:$0xf] }
 0x36a   : > { %1867 = vmatpush.bf16.msrb.mxu3 %v3783_v48  ;;  %v4021_v54 = vor.u32 %v4466_v50, %v4018_v52 }
 0x36b   : > { %3754 = vmatpush.msk.msra.mxu0 %vm1674_vm3, %v5775_v56  ;;  %3757 = vmatpush.msk.msrb.mxu1 %vm1674_vm3, %v5775_v56 }
 0x36c   : > { %3888 = vmatpush.msk.msrb.mxu2 %vm1674_vm3, %v5775_v56 }
 0x36d   : > { %1693 = vmatpush.msra.mxu0 %v5777_v57  ;;  %1742 = vmatpush.msrb.mxu1 %v5777_v57 }
 0x36e   : > { %2008 = vmatpush.msrb.mxu2 %v5777_v57  ;;  %3758 = vmatmul.msk.f32.vlgmr.msrb.gmra.mxu1 %vm1667_vm4, %v1719_v58  ;;  %v4408_v58 = vld [vmem:[#allocation5 + $0x24] sm:$0xf] }
 0x36f   : > { %1956 = vmatpush.bf16.msrb.mxu0 %v3883_v45  ;;  %1970 = vmatpush.bf16.msra.mxu1 %v3887_v7  ;;  %v3844_v45 = vld [vmem:[#allocation5 + $0x28] sm:$0xf0]  ;;  %v4451_v7 = vld [vmem:[#allocation5 + $0x174] sm:$0xf0] }
 0x370   : > { %3755 = vmatmul.msk.f32.vlgmr.msra.gmra.mxu0 %vm1667_vm4, %v1665_v26  ;;  %v3847_v44 = vor.u32 %v4408_v58, %v3844_v45  ;;  %1868 = vmatpush.bf16.msrb.mxu3 %v3775_v55  ;;  %v3764_v26 = vld [vmem:[#allocation5 + $0x88] sm:$0xf0]  ;;  %v3950_v10 = vor.u32 %v4451_v7, %v3949_v6  ;;  %v4444_v55 = vld [vmem:[#allocation5 + $0x144] sm:$0xf]  ;;  %v4008_v58 = vld [vmem:[#allocation5 + $0x1e0] sm:$0xf] }
 0x371   : > { %v3767_v39 = vor.u32 %v4420_v17, %v3764_v26  ;;  %v4465_v45 = vld [vmem:[#allocation5 + $0x1e4] sm:$0xf0]  ;;  %v4010_v17 = vld [vmem:[#allocation5 + $0x1e8] sm:$0xf0]  ;;  %v4440_v7 = vld [vmem:[#allocation5 + $0x124] sm:$0xf] }
 0x372   : > { %v4009_v26 = vor.u32 %v4465_v45, %v4008_v58  ;;  %v4483_v58 = vld [vmem:[#allocation5 + $0x274] sm:$0xf0] }
 0x373   : > { %1957 = vmatpush.bf16.msrb.mxu0 %v3875_v60  ;;  %1971 = vmatpush.bf16.msra.mxu1 %v3879_v18  ;;  %v3839_v60 = vor.u32 %v4406_v51, %v3836_v63  ;;  %v3951_v18 = vld [vmem:[#allocation5 + $0x178] sm:$0xf0]  ;;  %v4442_v51 = vld [vmem:[#allocation5 + $0x134] sm:$0xf] }
 0x374   : > { %1869 = vmatpush.bf16.msrb.mxu3 %v3767_v39  ;;  %v3954_v20 = vor.u32 %v4450_v15, %v3951_v18  ;;  %v3919_v63 = vld [vmem:[#allocation5 + $0x138] sm:$0xf0]  ;;  %v4438_v18 = vld [vmem:[#allocation5 + $0x114] sm:$0xf] }
 0x375   : > { %v3922_v61 = vor.u32 %v4442_v51, %v3919_v63 }
 0x376   : > { %3759 = vmatmul.msk.f32.gmra.mxu1 %vm1667_vm4, %v1720_v13 }
 0x377   : > { %1958 = vmatpush.bf16.msrb.mxu0 %v3867_v14  ;;  %1972 = vmatpush.bf16.msra.mxu1 %v3871_v27  ;;  %v4443_v27 = vld [vmem:[#allocation5 + $0x134] sm:$0xf0] }
 0x378   : > { %3756 = vmatmul.msk.f32.gmra.mxu0 %vm1667_vm4, %v1666_v22  ;;  %v4447_v22 = vld [vmem:[#allocation5 + $0x154] sm:$0xf0]  ;;  %2128 = vmatpush.bf16.msra.mxu3 %v3954_v20  ;;  %v3918_v30 = vor.u32 %v4443_v27, %v3917_v16  ;;  %v3984_v20 = vld [vmem:[#allocation5 + $0x1b0] sm:$0xf]  ;;  %v4436_v16 = vld [vmem:[#allocation5 + $0x104] sm:$0xf] }
 0x379   : > { %v3934_v23 = vor.u32 %v4447_v22, %v3933_v21  ;;  %v4459_v22 = vld [vmem:[#allocation5 + $0x1b4] sm:$0xf0]  ;;  %v3895_v27 = vld [vmem:[#allocation5 + $0x108] sm:$0xf0] }
 0x37b   : > { %1959 = vmatpush.bf16.msrb.mxu0 %v3859_v28  ;;  %1973 = vmatpush.bf16.msra.mxu1 %v3863_v35  ;;  %v3926_v28 = vor.u32 %v4445_v25, %v3925_v24  ;;  %v4439_v35 = vld [vmem:[#allocation5 + $0x114] sm:$0xf0]  ;;  %v3986_v24 = vld [vmem:[#allocation5 + $0x1b8] sm:$0xf0]  ;;  %v3985_v25 = vor.u32 %v4459_v22, %v3984_v20  ;;  %v4061_v20 = vld [vmem:[#allocation5 + $0x248] sm:$0xf0] }
 0x37c   : > { %v4051_v22 = vld [vmem:[#allocation5 + $0x230] sm:$0xf] }
 0x37f   : > { %1960 = vmatpush.bf16.msrb.mxu0 %v3851_v34  ;;  %1974 = vmatpush.bf16.msra.mxu1 %v3855_v53  ;;  %v3901_v34 = vld [vmem:[#allocation5 + $0x110] sm:$0xf]  ;;  %v4017_v53 = vor.u32 %v4467_v49, %v4016_v47 }
 0x380   : > { %v3902_v36 = vor.u32 %v4439_v35, %v3901_v34  ;;  %v3968_v35 = vld [vmem:[#allocation5 + $0x190] sm:$0xf] }
 0x383   : > { %1961 = vmatpush.bf16.msrb.mxu0 %v3843_v38  ;;  %1975 = vmatpush.bf16.msra.mxu1 %v3847_v44  ;;  %v4437_v38 = vld [vmem:[#allocation5 + $0x104] sm:$0xf0]  ;;  %v4464_v44 = vld [vmem:[#allocation5 + $0x1e4] sm:$0xf] }
 0x384   : > { %v3894_v1 = vor.u32 %v4437_v38, %v3893_v37  ;;  %v4013_v39 = vor.u32 %v4464_v44, %v4010_v17  ;;  %v3970_v38 = vld [vmem:[#allocation5 + $0x198] sm:$0xf0] }
 0x385   : > { %v4085_v17 = vld [vmem:[#allocation5 + $0x278] sm:$0xf0] }
 0x387   : > { %1962 = vmatpush.bf16.msrb.mxu0 %v3835_v41  ;;  %1976 = vmatpush.bf16.msra.mxu1 %v3839_v60  ;;  %v4448_v41 = vld [vmem:[#allocation5 + $0x164] sm:$0xf]  ;;  %v4000_v60 = vld [vmem:[#allocation5 + $0x1d0] sm:$0xf] }
 0x388   : > { %v3946_v43 = vor.u32 %v4448_v41, %v3943_v2 }
 0x38a   : > { %2129 = vmatpush.bf16.msra.mxu3 %v3946_v43  ;;  %v4452_v43 = vld [vmem:[#allocation5 + $0x184] sm:$0xf] }
 0x38b   : > { %1963 = vmatpush.bf16.msrb.mxu0 %v3827_v3  ;;  %1977 = vmatpush.bf16.msra.mxu1 %v3831_v4  ;;  %v4446_v3 = vld [vmem:[#allocation5 + $0x154] sm:$0xf] }
 0x38c   : > { %v3938_v48 = vor.u32 %v4446_v3, %v3935_v46  ;;  %v4462_v4 = vld [vmem:[#allocation5 + $0x1d4] sm:$0xf]  ;;  %v3962_v3 = vld [vmem:[#allocation5 + $0x188] sm:$0xf0] }
 0x38d   : > { %v3965_v47 = vor.u32 %v4452_v43, %v3962_v3 }
 0x38e   : > { %2130 = vmatpush.bf16.msra.mxu3 %v3938_v48 }
 0x38f   : > { %3955 = vmatpush.msk.msra.mxu0 %vm1674_vm3, %v5775_v56  ;;  %2276 = vmatpush.bf16.msrb.mxu1 %v4017_v53 }
 0x391   : > { %2170 = vmatpush.msra.mxu0 %v5777_v57 }
 0x393   : > { %2277 = vmatpush.bf16.msrb.mxu1 %v4009_v26 }
 0x3eb   : > { %v1744_v5 = vpop.f32.mrf.mxu1 }
 0x3ed   : > { %v1695_v9 = vpop.f32.mrf.mxu0 }
 0x3f3   : > { %v1747_v8 = vpop.f32.mrf.mxu1 }
 0x3f4   : > { %v1750_v59 = vpack.c.bf16 %v1747_v8, %v1744_v5  ;;  %v4002_v5 = vld [vmem:[#allocation5 + $0x1d8] sm:$0xf0]  ;;  %v3911_v8 = vld [vmem:[#allocation5 + $0x128] sm:$0xf0] }
 0x3f5   : > { %v1698_v13 = vpop.f32.mrf.mxu0  ;;  %v4005_v6 = vor.u32 %v4462_v4, %v4002_v5  ;;  %v4481_v4 = vld [vmem:[#allocation5 + $0x264] sm:$0xf0]  ;;  %v4480_v5 = vld [vmem:[#allocation5 + $0x264] sm:$0xf] }
 0x3f6   : > { %1856 = vmatmul.bf16.vlgmr.msra.gmra.mxu2 %v1750_v59  ;;  %1870 = vmatmul.bf16.vlgmr.msrb.gmra.mxu3 %v1750_v59  ;;  %v1701_v14 = vpack.c.bf16 %v1698_v13, %v1695_v9  ;;  %v4001_v9 = vor.u32 %v4463_v62, %v4000_v60  ;;  %v3914_v59 = vor.u32 %v4440_v7, %v3911_v8  ;;  %v3994_v13 = vld [vmem:[#allocation5 + $0x1c8] sm:$0xf0]  ;;  %v2309_v60 = vld [vmem:[#allocation2 + $0x40] sm:$0xff]  ;;  %v4075_v62 = vld [vmem:[#allocation5 + $0x260] sm:$0xf] }
 0x3f7   : > { %2114 = vmatpush.bf16.msra.mxu2 %v3950_v10  ;;  %v3992_v10 = vld [vmem:[#allocation5 + $0x1c0] sm:$0xf]  ;;  %v3997_v15 = vor.u32 %v4460_v12, %v3994_v13  ;;  %v4067_v8 = vld [vmem:[#allocation5 + $0x250] sm:$0xf]  ;;  %v4069_v12 = vld [vmem:[#allocation5 + $0x258] sm:$0xf0] }
 0x3f8   : > { %1964 = vmatmul.bf16.vlgmr.msrb.gmra.mxu0 %v1701_v14  ;;  %1978 = vmatmul.bf16.vlgmr.msra.gmra.mxu1 %v1701_v14  ;;  %v3993_v14 = vor.u32 %v4461_v11, %v3992_v10  ;;  %v4479_v10 = vld [vmem:[#allocation5 + $0x254] sm:$0xf0] }
 0x3f9   : > { %2290 = vmatpush.bf16.msrb.mxu0 %v4021_v54  ;;  %2278 = vmatpush.bf16.msrb.mxu1 %v4001_v9  ;;  %v4076_v9 = vor.u32 %v4481_v4, %v4075_v62  ;;  %v4068_v11 = vor.u32 %v4479_v10, %v4067_v8 }
 0x3fb   : > { %2115 = vmatpush.bf16.msra.mxu2 %v3942_v19  ;;  %v3903_v19 = vld [vmem:[#allocation5 + $0x118] sm:$0xf0] }
 0x3fc   : > { %v3906_v21 = vor.u32 %v4438_v18, %v3903_v19  ;;  %v4476_v18 = vld [vmem:[#allocation5 + $0x244] sm:$0xf] }
 0x3fd   : > { %2291 = vmatpush.bf16.msrb.mxu0 %v4013_v39  ;;  %2279 = vmatpush.bf16.msrb.mxu1 %v3993_v14  ;;  %v4059_v14 = vld [vmem:[#allocation5 + $0x240] sm:$0xf] }
 0x3ff   : > { %2116 = vmatpush.bf16.msra.mxu2 %v3934_v23  ;;  %v4458_v23 = vld [vmem:[#allocation5 + $0x1b4] sm:$0xf] }
 0x401   : > { %2292 = vmatpush.bf16.msrb.mxu0 %v4005_v6  ;;  %2280 = vmatpush.bf16.msrb.mxu1 %v3985_v25  ;;  %v4077_v6 = vld [vmem:[#allocation5 + $0x268] sm:$0xf0] }
 0x402   : > { %v4080_v7 = vor.u32 %v4480_v5, %v4077_v6 }
 0x403   : > { %2117 = vmatpush.bf16.msra.mxu2 %v3926_v28  ;;  %v3989_v28 = vor.u32 %v4458_v23, %v3986_v24  ;;  %v4475_v23 = vld [vmem:[#allocation5 + $0x234] sm:$0xf0]  ;;  %v4474_v24 = vld [vmem:[#allocation5 + $0x234] sm:$0xf] }
 0x404   : > { %v4052_v25 = vor.u32 %v4475_v23, %v4051_v22  ;;  %v4507_v22 = vld [vmem:[#allocation8 + $0xb8] sm:$0xff] }
 0x405   : > { %2293 = vmatpush.bf16.msrb.mxu0 %v3997_v15  ;;  %v4477_v15 = vld [vmem:[#allocation5 + $0x244] sm:$0xf0] }
 0x406   : > { %3889 = vmatmul.msk.f32.vlgmr.msrb.gmra.mxu2 %vm1667_vm4, %v1985_v29  ;;  %v3976_v29 = vld [vmem:[#allocation5 + $0x1a0] sm:$0xf]  ;;  %v4060_v19 = vor.u32 %v4477_v15, %v4059_v14  ;;  %v4495_v23 = vld [vmem:[#allocation8 + $0x58] sm:$0xff] }
 0x407   : > { %2118 = vmatpush.bf16.msra.mxu2 %v3918_v30  ;;  %v3898_v30 = vor.u32 %v4436_v16, %v3895_v27  ;;  %v4043_v27 = vld [vmem:[#allocation5 + $0x220] sm:$0xf] }
 0x408   : > { %3956 = vmatmul.msk.f32.vlgmr.msra.gmra.mxu0 %vm1667_vm4, %v2147_v33  ;;  %v3978_v33 = vld [vmem:[#allocation5 + $0x1a8] sm:$0xf0] }
 0x409   : > { %2294 = vmatpush.bf16.msrb.mxu0 %v3989_v28  ;;  %v3981_v34 = vor.u32 %v4456_v32, %v3978_v33  ;;  %v4053_v28 = vld [vmem:[#allocation5 + $0x238] sm:$0xf0]  ;;  %v4045_v32 = vld [vmem:[#allocation5 + $0x228] sm:$0xf0] }
 0x40a   : > { %v4056_v16 = vor.u32 %v4474_v24, %v4053_v28  ;;  %v4515_v24 = vld [vmem:[#allocation8 + $0xf8] sm:$0xff]  ;;  %v4506_v28 = vld [vmem:[#allocation8 + $0xb0] sm:$0xff] }
 0x40b   : > { %2119 = vmatpush.bf16.msra.mxu2 %v3910_v40  ;;  %v3977_v40 = vor.u32 %v4457_v31, %v3976_v29  ;;  %v4473_v29 = vld [vmem:[#allocation5 + $0x224] sm:$0xf0] }
 0x40c   : > { %v4044_v31 = vor.u32 %v4473_v29, %v4043_v27  ;;  %v4494_v27 = vld [vmem:[#allocation8 + $0x50] sm:$0xff]  ;;  %v4489_v29 = vld [vmem:[#allocation8 + $0x28] sm:$0xff] }
 0x40d   : > { %2281 = vmatpush.bf16.msrb.mxu1 %v3977_v40  ;;  %2295 = vmatpush.bf16.msrb.mxu0 %v3981_v34  ;;  %v4035_v40 = vld [vmem:[#allocation5 + $0x210] sm:$0xf]  ;;  %v4471_v34 = vld [vmem:[#allocation5 + $0x214] sm:$0xf0] }
 0x40e   : > { %3890 = vmatmul.msk.f32.gmra.mxu2 %vm1667_vm4, %v1986_v42  ;;  %v4455_v42 = vld [vmem:[#allocation5 + $0x194] sm:$0xf0] }
 0x40f   : > { %2120 = vmatpush.bf16.msra.mxu2 %v3902_v36  ;;  %v4454_v36 = vld [vmem:[#allocation5 + $0x194] sm:$0xf]  ;;  %v3969_v37 = vor.u32 %v4455_v42, %v3968_v35  ;;  %v4036_v42 = vor.u32 %v4471_v34, %v4035_v40 }
 0x410   : > { %3957 = vmatmul.msk.f32.gmra.mxu0 %vm1667_vm4, %v2148_v0  ;;  %v3960_v0 = vld [vmem:[#allocation5 + $0x180] sm:$0xf]  ;;  %v3973_v2 = vor.u32 %v4454_v36, %v3970_v38  ;;  %v4470_v35 = vld [vmem:[#allocation5 + $0x214] sm:$0xf]  ;;  %v4037_v36 = vld [vmem:[#allocation5 + $0x218] sm:$0xf0] }
 0x411   : > { %2282 = vmatpush.bf16.msrb.mxu1 %v3969_v37  ;;  %v4040_v37 = vor.u32 %v4470_v35, %v4037_v36  ;;  %v4027_v38 = vld [vmem:[#allocation5 + $0x200] sm:$0xf]  ;;  %v4504_v40 = vld [vmem:[#allocation8 + $0xa0] sm:$0xff]  ;;  %v4487_v36 = vld [vmem:[#allocation8 + $0x18] sm:$0xff] }
 0x412   : > { %2296 = vmatpush.bf16.msrb.mxu0 %v3973_v2  ;;  %v4029_v2 = vld [vmem:[#allocation5 + $0x208] sm:$0xf0]  ;;  %v4512_v34 = vld [vmem:[#allocation8 + $0xe0] sm:$0xff] }
 0x413   : > { %2121 = vmatpush.bf16.msra.mxu2 %v3894_v1  ;;  %v4453_v1 = vld [vmem:[#allocation5 + $0x184] sm:$0xf0]  ;;  %v4492_v35 = vld [vmem:[#allocation8 + $0x40] sm:$0xff] }
 0x414   : > { %v3961_v46 = vor.u32 %v4453_v1, %v3960_v0  ;;  %v4469_v0 = vld [vmem:[#allocation5 + $0x204] sm:$0xf0]  ;;  %v4468_v1 = vld [vmem:[#allocation5 + $0x204] sm:$0xf] }
 0x415   : > { %v4032_v43 = vor.u32 %v4468_v1, %v4029_v2  ;;  %v4486_v1 = vld [vmem:[#allocation8 + $0x10] sm:$0xff] }
 0x416   : > { %2283 = vmatpush.bf16.msrb.mxu1 %v3961_v46  ;;  %2297 = vmatpush.bf16.msrb.mxu0 %v3965_v47  ;;  %v4510_v2 = vld [vmem:[#allocation8 + $0xd0] sm:$0xff] }
 0x417   : > { %4022 = vmatpush.msk.msrb.mxu2 %vm1674_vm3, %v5775_v56  ;;  %v3927_v56 = vld [vmem:[#allocation5 + $0x148] sm:$0xf0] }
 0x419   : > { %2332 = vmatpush.msrb.mxu2 %v5777_v57  ;;  %v3930_v57 = vor.u32 %v4444_v55, %v3927_v56  ;;  %v4083_v56 = vld [vmem:[#allocation5 + $0x270] sm:$0xf] }
 0x41a   : > { %v4084_v44 = vor.u32 %v4483_v58, %v4083_v56 }
 0x41b   : > { %2131 = vmatpush.bf16.msra.mxu3 %v3930_v57  ;;  %v4482_v57 = vld [vmem:[#allocation5 + $0x274] sm:$0xf] }
 0x41c   : > { %v4088_v39 = vor.u32 %v4482_v57, %v4085_v17 }
 0x41e   : > { %2452 = vmatpush.bf16.msra.mxu1 %v4088_v39  ;;  %v4499_v39 = vld [vmem:[#allocation8 + $0x78] sm:$0xff] }
 0x41f   : > { %2132 = vmatpush.bf16.msra.mxu3 %v3922_v61  ;;  %v2310_v61 = vld [vmem:[#allocation2 + $0x48] sm:$0x3] }
 0x422   : > { %2453 = vmatpush.bf16.msra.mxu1 %v4080_v7 }
 0x423   : > { %2133 = vmatpush.bf16.msra.mxu3 %v3914_v59  ;;  %v4478_v59 = vld [vmem:[#allocation5 + $0x254] sm:$0xf] }
 0x424   : > { %v4072_v13 = vor.u32 %v4478_v59, %v4069_v12 }
 0x426   : > { %2454 = vmatpush.bf16.msra.mxu1 %v4072_v13 }
 0x427   : > { %2134 = vmatpush.bf16.msra.mxu3 %v3906_v21  ;;  %v4064_v21 = vor.u32 %v4476_v18, %v4061_v20  ;;  %v4496_v20 = vld [vmem:[#allocation8 + $0x60] sm:$0xff] }
 0x42a   : > { %2455 = vmatpush.bf16.msra.mxu1 %v4064_v21  ;;  %v4491_v21 = vld [vmem:[#allocation8 + $0x38] sm:$0xff] }
 0x42b   : > { %2135 = vmatpush.bf16.msra.mxu3 %v3898_v30  ;;  %v4472_v30 = vld [vmem:[#allocation5 + $0x224] sm:$0xf] }
 0x42c   : > { %v4048_v33 = vor.u32 %v4472_v30, %v4045_v32  ;;  %v4505_v30 = vld [vmem:[#allocation8 + $0xa8] sm:$0xff] }
 0x42d   : > { %v4493_v32 = vld [vmem:[#allocation8 + $0x48] sm:$0xff] }
 0x42e   : > { %2456 = vmatpush.bf16.msra.mxu1 %v4056_v16  ;;  %v4514_v16 = vld [vmem:[#allocation8 + $0xf0] sm:$0xff] }
 0x42f   : > { %2438 = vmatpush.bf16.msrb.mxu3 %v4084_v44 }
 0x432   : > { %2457 = vmatpush.bf16.msra.mxu1 %v4048_v33  ;;  %v4488_v33 = vld [vmem:[#allocation8 + $0x20] sm:$0xff] }
 0x433   : > { %2439 = vmatpush.bf16.msrb.mxu3 %v4076_v9 }
 0x436   : > { %2458 = vmatpush.bf16.msra.mxu1 %v4040_v37  ;;  %v4503_v37 = vld [vmem:[#allocation8 + $0x98] sm:$0xff] }
 0x437   : > { %2440 = vmatpush.bf16.msrb.mxu3 %v4068_v11  ;;  %v2470_v11 = vld [vmem:[#allocation7] sm:$0xff] }
 0x43a   : > { %2459 = vmatpush.bf16.msra.mxu1 %v4032_v43  ;;  %v4521_v43 = vld [vmem:[#allocation8 + $0x128] sm:$0xff] }
 0x43b   : > { %2441 = vmatpush.bf16.msrb.mxu3 %v4060_v19  ;;  %v2523_v19 = vld [vmem:[#allocation7 + $0x8] sm:$0xff] }
 0x43f   : > { %2442 = vmatpush.bf16.msrb.mxu3 %v4052_v25  ;;  %v4490_v25 = vld [vmem:[#allocation8 + $0x30] sm:$0xff] }
 0x443   : > { %2443 = vmatpush.bf16.msrb.mxu3 %v4044_v31  ;;  %v4513_v31 = vld [vmem:[#allocation8 + $0xe8] sm:$0xff] }
 0x447   : > { %2444 = vmatpush.bf16.msrb.mxu3 %v4036_v42  ;;  %v4523_v42 = vld [vmem:[#allocation8 + $0x138] sm:$0xff] }
 0x475   : > { %v1965_v41 = vpop.f32.mrf.mxu0 }
 0x479   : > { %v1857_v48 = vpop.f32.mrf.mxu2  ;;  %v1871_v56 = vpop.f32.mrf.mxu3 }
 0x47a   : > { %v5802_v49 = vadd.f32 %v1965_v41, %v1857_v48  ;;  %v4028_v41 = vor.u32 %v4469_v0, %v4027_v38  ;;  %v4511_v38 = vld [vmem:[#allocation8 + $0xd8] sm:$0xff]  ;;  %v4522_v0 = vld [vmem:[#allocation8 + $0x130] sm:$0xff] }
 0x47c   : > { %2445 = vmatpush.bf16.msrb.mxu3 %v4028_v41  ;;  %v4502_v41 = vld [vmem:[#allocation8 + $0x90] sm:$0xff] }
 0x47d   : > { %v1967_v50 = vpop.f32.mrf.mxu0 }
 0x481   : > { %v1859_v52 = vpop.f32.mrf.mxu2  ;;  %v1873_v57 = vpop.f32.mrf.mxu3 }
 0x482   : > { %v5804_v53 = vadd.f32 %v1967_v50, %v1859_v52 }
 0x485   : > { %v2172_v54 = vpop.f32.mrf.mxu0 }
 0x489   : > { %v2010_v55 = vpop.f32.mrf.mxu2 }
 0x48d   : > { %v2175_v45 = vpop.f32.mrf.mxu0 }
 0x48e   : > { %v2178_v26 = vpack.c.bf16 %v2175_v45, %v2172_v54 }
 0x490   : > { %2284 = vmatmul.bf16.vlgmr.msrb.gmra.mxu1 %v2178_v26  ;;  %2298 = vmatmul.bf16.vlgmr.msrb.gmra.mxu0 %v2178_v26 }
 0x491   : > { %v2013_v51 = vpop.f32.mrf.mxu2  ;;  %2737 = vmatpush.bf16.msrb.mxu1 %v4491_v21 }
 0x492   : > { %v2016_v63 = vpack.c.bf16 %v2013_v51, %v2010_v55  ;;  %v1979_v55 = vpop.f32.mrf.mxu1 }
 0x494   : > { %2122 = vmatmul.bf16.vlgmr.msra.gmra.mxu2 %v2016_v63  ;;  %2136 = vmatmul.bf16.vlgmr.msra.gmra.mxu3 %v2016_v63 }
 0x495   : > { %2676 = vmatpush.bf16.msra.mxu3 %v4499_v39  ;;  %2738 = vmatpush.bf16.msrb.mxu1 %v4490_v25 }
 0x499   : > { %2739 = vmatpush.bf16.msrb.mxu1 %v4489_v29 }
 0x49a   : > { %v1981_v58 = vpop.f32.mrf.mxu1 }
 0x49d   : > { %2740 = vmatpush.bf16.msrb.mxu1 %v4488_v33 }
 0x4a1   : > { %2741 = vmatpush.bf16.msrb.mxu1 %v4487_v36 }
 0x4a4   : > { %4023 = vmatmul.msk.f32.vlgmr.msrb.gmra.mxu2 %vm1667_vm4, %v2309_v60  ;;  %v1982_v60 = vadd.f32 %v1981_v58, %v1873_v57  ;;  %v4519_v58 = vld [vmem:[#allocation8 + $0x118] sm:$0xff]  ;;  %v4518_v57 = vld [vmem:[#allocation8 + $0x110] sm:$0xff] }
 0x4a5   : > { %2742 = vmatpush.bf16.msrb.mxu1 %v4486_v1 }
 0x4ac   : > { %4024 = vmatmul.msk.f32.gmra.mxu2 %vm1667_vm4, %v2310_v61  ;;  %v1980_v61 = vadd.f32 %v1979_v55, %v1871_v56  ;;  %v4508_v55 = vld [vmem:[#allocation8 + $0xc0] sm:$0xff] }
 0x50d   : > { %v2285_v45 = vpop.f32.mrf.mxu1  ;;  %v2299_v26 = vpop.f32.mrf.mxu0 }
 0x515   : > { %v2287_v17 = vpop.f32.mrf.mxu1  ;;  %v2301_v4 = vpop.f32.mrf.mxu0 }
 0x517   : > { %v2123_v3 = vpop.f32.mrf.mxu2  ;;  %v2137_v44 = vpop.f32.mrf.mxu3 }
 0x518   : > { %v2142_v46 = vadd.f32 %v2123_v3, %v5802_v49  ;;  %v4498_v49 = vld [vmem:[#allocation8 + $0x70] sm:$0xff]  ;;  %v2143_v5 = vadd.f32 %v2137_v44, %v1980_v61  ;;  %v4485_v3 = vld [vmem:[#allocation8 + $0x8] sm:$0xff]  ;;  %v2576_v44 = vlaneseq }
 0x519   : > { %2677 = vmatpush.bf16.msra.mxu3 %v4498_v49  ;;  %2743 = vmatpush.bf16.msrb.mxu1 %v4485_v3  ;;  %v4653_v49 = vld [vmem:[%s5870_s8] ss:$0 sm:$0xff]  ;;  %v4530_v3 = vld [vmem:[#allocation10 + $0x30] sm:$0xff] }
 0x51a   : > { %v2305_v8 = vadd.f32 %v2299_v26, %v2143_v5  ;;  %v2304_v14 = vadd.f32 %v2285_v45, %v2142_v46  ;;  %v4501_v46 = vld [vmem:[#allocation8 + $0x88] sm:$0xff] }
 0x51f   : > { %v2125_v47 = vpop.f32.mrf.mxu2  ;;  %v2139_v51 = vpop.f32.mrf.mxu3 }
 0x520   : > { %v2144_v48 = vadd.f32 %v2125_v47, %v5804_v53  ;;  %v4497_v53 = vld [vmem:[#allocation8 + $0x68] sm:$0xff]  ;;  %v2145_v62 = vadd.f32 %v2139_v51, %v1982_v60  ;;  %v4516_v60 = vld [vmem:[#allocation8 + $0x100] sm:$0xff] }
 0x521   : > { %2678 = vmatpush.bf16.msra.mxu3 %v4497_v53  ;;  %v4509_v47 = vld [vmem:[#allocation8 + $0xc8] sm:$0xff] }
 0x522   : > { %v2307_v6 = vadd.f32 %v2301_v4, %v2145_v62  ;;  %v2306_v12 = vadd.f32 %v2287_v17, %v2144_v48  ;;  %v4520_v48 = vld [vmem:[#allocation8 + $0x120] sm:$0xff]  ;;  %v4517_v17 = vld [vmem:[#allocation8 + $0x108] sm:$0xff]  ;;  %v4531_v4 = vld [vmem:[#allocation10 + $0x38] sm:$0xff] }
 0x525   : > { %2679 = vmatpush.bf16.msra.mxu3 %v4496_v20 }
 0x527   : > { %v2334_v50 = vpop.f32.mrf.mxu2 }
 0x529   : > { %2680 = vmatpush.bf16.msra.mxu3 %v4495_v23 }
 0x52d   : > { %2681 = vmatpush.bf16.msra.mxu3 %v4494_v27 }
 0x52f   : > { %v2337_v52 = vpop.f32.mrf.mxu2 }
 0x530   : > { %v2340_v54 = vpack.c.bf16 %v2337_v52, %v2334_v50  ;;  %v4484_v52 = vld [vmem:[#allocation8] sm:$0xff] }
 0x531   : > { %2682 = vmatpush.bf16.msra.mxu3 %v4493_v32  ;;  %2744 = vmatpush.bf16.msrb.mxu1 %v4484_v52  ;;  %v4525_v52 = vld [vmem:[#allocation10 + $0x8] sm:$0xff] }
 0x532   : > { %2446 = vmatmul.bf16.vlgmr.msrb.gmra.mxu3 %v2340_v54  ;;  %2460 = vmatmul.bf16.vlgmr.msra.gmra.mxu1 %v2340_v54  ;;  %v4500_v54 = vld [vmem:[#allocation8 + $0x80] sm:$0xff] }
 0x535   : > { %2683 = vmatpush.bf16.msra.mxu3 %v4492_v35  ;;  %3080 = vmatpush.bf16.msra.mxu1 %v4531_v4 }
 0x539   : > { %2997 = vmatpush.bf16.msrb.mxu3 %v4523_v42  ;;  %3081 = vmatpush.bf16.msra.mxu1 %v4530_v3 }
 0x53d   : > { %2998 = vmatpush.bf16.msrb.mxu3 %v4522_v0 }
 0x541   : > { %2999 = vmatpush.bf16.msrb.mxu3 %v4521_v43 }
 0x545   : > { %3000 = vmatpush.bf16.msrb.mxu3 %v4520_v48  ;;  %v4527_v48 = vld [vmem:[#allocation10 + $0x18] sm:$0xff] }
 0x549   : > { %3001 = vmatpush.bf16.msrb.mxu3 %v4519_v58 }
 0x54d   : > { %3002 = vmatpush.bf16.msrb.mxu3 %v4518_v57  ;;  %v4538_v57 = vld [vmem:[#allocation11 + $0x30] sm:$0xff] }
 0x551   : > { %3003 = vmatpush.bf16.msrb.mxu3 %v4517_v17 }
 0x555   : > { %3004 = vmatpush.bf16.msrb.mxu3 %v4516_v60 }
 0x5af   : > { %v2461_v63 = vpop.f32.mrf.mxu1 }
 0x5b0   : > { %v2467_v59 = vadd.f32 %v2461_v63, %v2305_v8  ;;  %v2577_v63 = vshrl.u32 %v2576_v44, 7 }
 0x5b2   : > { %vm2603_vm7 = vcmp.eq.s32.totalorder %v2577_v63, 1  ;;  %vm2578_vm8 = vcmp.eq.s32.totalorder %v2577_v63, 0  ;;  %vm2750_vm9 = vcmp.eq.s32.totalorder %v2577_v63, 2  ;;  %vm2837_vm10 = vcmp.eq.s32.totalorder %v2577_v63, 3 }
 0x5b3   : > { %vm2924_vm11 = vcmp.eq.s32.totalorder %v2577_v63, 4  ;;  %v4535_v63 = vld [vmem:[#allocation11 + $0x18] sm:$0xff] }
 0x5b5   : > { %v2447_v9 = vpop.f32.mrf.mxu3 }
 0x5b6   : > { %v2466_v18 = vadd.f32 %v2447_v9, %v2304_v14 }
 0x5b7   : > { %v2463_v7 = vpop.f32.mrf.mxu1 }
 0x5b8   : > { %v2469_v10 = vadd.f32 %v2463_v7, %v2307_v6 }
 0x5ba   : > { %4091 = vmatpush.msk.msra.mxu0 %vm2475_vm5, %v2469_v10 }
 0x5bc   : > { %2517 = vmatpush.msra.mxu0 %v2467_v59 }
 0x5bd   : > { %v2449_v13 = vpop.f32.mrf.mxu3  ;;  %4092 = vmatmul.msk.f32.vlgmr.msra.gmra.mxu0 %vm2471_vm6, %v2470_v11 }
 0x5be   : > { %4095 = vmatpush.msk.msrb.mxu0 %vm2475_vm5, %v2469_v10  ;;  %v2468_v15 = vadd.f32 %v2449_v13, %v2306_v12 }
 0x5c0   : > { %2562 = vmatpush.msrb.mxu0 %v2467_v59  ;;  %4089 = vmatpush.msk.msra.mxu2 %vm2475_vm5, %v2468_v15 }
 0x5c2   : > { %2497 = vmatpush.msra.mxu2 %v2466_v18  ;;  %2910 = vmatpush.bf16.msra.mxu0 %v4515_v24 }
 0x5c3   : > { %4090 = vmatmul.msk.f32.vlgmr.msra.gmra.mxu2 %vm2471_vm6, %v2470_v11 }
 0x5c4   : > { %4093 = vmatpush.msk.msrb.mxu2 %vm2475_vm5, %v2468_v15 }
 0x5c5   : > { %4096 = vmatmul.msk.f32.vlgmr.msrb.gmra.mxu0 %vm2471_vm6, %v2523_v19 }
 0x5c6   : > { %2542 = vmatpush.msrb.mxu2 %v2466_v18  ;;  %2911 = vmatpush.bf16.msra.mxu0 %v4514_v16 }
 0x5c8   : > { %2823 = vmatpush.bf16.msra.mxu2 %v4507_v22 }
 0x5ca   : > { %2912 = vmatpush.bf16.msra.mxu0 %v4513_v31 }
 0x5cb   : > { %4094 = vmatmul.msk.f32.vlgmr.msrb.gmra.mxu2 %vm2471_vm6, %v2523_v19 }
 0x5cc   : > { %2824 = vmatpush.bf16.msra.mxu2 %v4506_v28 }
 0x5ce   : > { %2913 = vmatpush.bf16.msra.mxu0 %v4512_v34 }
 0x5d0   : > { %2825 = vmatpush.bf16.msra.mxu2 %v4505_v30 }
 0x5d2   : > { %2914 = vmatpush.bf16.msra.mxu0 %v4511_v38 }
 0x5d4   : > { %2826 = vmatpush.bf16.msra.mxu2 %v4504_v40 }
 0x5d6   : > { %2915 = vmatpush.bf16.msra.mxu0 %v4510_v2 }
 0x5d8   : > { %2827 = vmatpush.bf16.msra.mxu2 %v4503_v37 }
 0x5da   : > { %2916 = vmatpush.bf16.msra.mxu0 %v4509_v47  ;;  %v4528_v47 = vld [vmem:[#allocation10 + $0x20] sm:$0xff] }
 0x5dc   : > { %2828 = vmatpush.bf16.msra.mxu2 %v4502_v41 }
 0x5de   : > { %2917 = vmatpush.bf16.msra.mxu0 %v4508_v55  ;;  %v4539_v55 = vld [vmem:[#allocation11 + $0x38] sm:$0xff] }
 0x5e0   : > { %2829 = vmatpush.bf16.msra.mxu2 %v4501_v46  ;;  %v4529_v46 = vld [vmem:[#allocation10 + $0x28] sm:$0xff] }
 0x5e1   : > { %3082 = vmatpush.bf16.msra.mxu1 %v4529_v46 }
 0x5e4   : > { %2830 = vmatpush.bf16.msra.mxu2 %v4500_v54  ;;  %v4524_v54 = vld [vmem:[#allocation10] sm:$0xff] }
 0x5e5   : > { %3083 = vmatpush.bf16.msra.mxu1 %v4528_v47 }
 0x5e8   : > { %3160 = vmatpush.bf16.msrb.mxu2 %v4539_v55 }
 0x5e9   : > { %3084 = vmatpush.bf16.msra.mxu1 %v4527_v48 }
 0x5ec   : > { %3161 = vmatpush.bf16.msrb.mxu2 %v4538_v57 }
 0x63a   : > { %v2519_v50 = vpop.f32.mrf.mxu0 }
 0x642   : > { %v2564_v45 = vpop.f32.mrf.mxu0 }
 0x643   : > { %v2568_v51 = vmax.f32 %v2519_v50, %v2564_v45  ;;  %v4526_v50 = vld [vmem:[#allocation10 + $0x10] sm:$0xff]  ;;  %v4537_v45 = vld [vmem:[#allocation11 + $0x28] sm:$0xff] }
 0x644   : > { %3085 = vmatpush.bf16.msra.mxu1 %v4526_v50  ;;  %3162 = vmatpush.bf16.msrb.mxu2 %v4537_v45 }
 0x646   : > { %v2499_v56 = vpop.f32.mrf.mxu2 }
 0x648   : > { %3086 = vmatpush.bf16.msra.mxu1 %v4525_v52 }
 0x64c   : > { %3087 = vmatpush.bf16.msra.mxu1 %v4524_v54 }
 0x64e   : > { %v2544_v26 = vpop.f32.mrf.mxu2 }
 0x64f   : > { %v2567_v39 = vmax.f32 %v2499_v56, %v2544_v26 }
 0x651   : > { %v2569_v53 = vmax.f32 %v2567_v39, %v2568_v51  ;;  %v4536_v51 = vld [vmem:[#allocation11 + $0x20] sm:$0xff] }
 0x652   : > { %3163 = vmatpush.bf16.msrb.mxu2 %v4536_v51 }
 0x653   : > { %v2574_v61 = vadd.f32 %v4653_v49, %v2569_v53 }
 0x655   : > { %v2575_v62 = vmax.f32 %v2574_v61, 0.0 }
 0x656   : > { %3164 = vmatpush.bf16.msrb.mxu2 %v4535_v63 }
 0x657   : > { %v2604_v5 = vsel %vm2603_vm7, %v2575_v62, 0.0  ;;  %v2579_v9 = vsel %vm2578_vm8, %v2575_v62, 0.0  ;;  %v2751_v6 = vsel %vm2750_vm9, %v2575_v62, 0.0  ;;  %v2838_v7 = vsel %vm2837_vm10, %v2575_v62, 0.0 }
 0x658   : > { %v2605_v8 = vrot.slane %v2604_v5, 4  ;;  %v2580_v10 = vrot.slane %v2579_v9, 4  ;;  %v2752_v59 = vrot.slane %v2751_v6, 4  ;;  %v2839_v11 = vrot.slane %v2838_v7, 4 }
 0x659   : > { %v2925_v12 = vsel %vm2924_vm11, %v2575_v62, 0.0  ;;  %v4534_v62 = vld [vmem:[#allocation11 + $0x10] sm:$0xff] }
 0x65a   : > { %v2606_v13 = vadd.f32 %v2605_v8, %v2604_v5  ;;  %v2581_v14 = vadd.f32 %v2580_v10, %v2579_v9  ;;  %v2753_v15 = vadd.f32 %v2752_v59, %v2751_v6  ;;  %v2840_v18 = vadd.f32 %v2839_v11, %v2838_v7  ;;  %3165 = vmatpush.bf16.msrb.mxu2 %v4534_v62  ;;  %v3011_v9 = vld [vmem:[%s5872_s10] sm:$0x1]  ;;  %v4533_v11 = vld [vmem:[#allocation11 + $0x8] sm:$0xff] }
 0x65b   : > { %v2926_v19 = vrot.slane %v2925_v12, 4 }
 0x65c   : > { %v2607_v20 = vrot.slane %v2606_v13, 2  ;;  %v2582_v21 = vrot.slane %v2581_v14, 2  ;;  %v2754_v22 = vrot.slane %v2753_v15, 2  ;;  %v2841_v23 = vrot.slane %v2840_v18, 2 }
 0x65d   : > { %v2927_v27 = vadd.f32 %v2926_v19, %v2925_v12  ;;  %v4532_v12 = vld [vmem:[#allocation11] sm:$0xff] }
 0x65e   : > { %v2608_v24 = vadd.f32 %v2607_v20, %v2606_v13  ;;  %v2583_v25 = vadd.f32 %v2582_v21, %v2581_v14  ;;  %v2755_v28 = vadd.f32 %v2754_v22, %v2753_v15  ;;  %v2842_v16 = vadd.f32 %v2841_v23, %v2840_v18  ;;  %3166 = vmatpush.bf16.msrb.mxu2 %v4533_v11  ;;  %v3031_v13 = vld [vmem:[%s5907_s20] sm:$0x1] }
 0x65f   : > { %v2928_v42 = vrot.slane %v2927_v27, 2  ;;  %v3111_v21 = vld [vmem:[%s5910_s18] sm:$0x1] }
 0x660   : > { %v2609_v29 = vrot.slane %v2608_v24, 1  ;;  %v2584_v30 = vrot.slane %v2583_v25, 1  ;;  %v2756_v31 = vrot.slane %v2755_v28, 1  ;;  %v2843_v32 = vrot.slane %v2842_v16, 1 }
 0x661   : > { %v2929_v1 = vadd.f32 %v2928_v42, %v2927_v27 }
 0x662   : > { %v2610_v33 = vadd.f32 %v2609_v29, %v2608_v24  ;;  %v2585_v40 = vadd.f32 %v2584_v30, %v2583_v25  ;;  %v2757_v34 = vadd.f32 %v2756_v31, %v2755_v28  ;;  %v2844_v35 = vadd.f32 %v2843_v32, %v2842_v16  ;;  %3167 = vmatpush.bf16.msrb.mxu2 %v4532_v12 }
 0x663   : > { %v2930_v41 = vrot.slane %v2929_v1, 1 }
 0x664   : > { %v2611_v36 = vpack.c.bf16 %v2610_v33, %v2610_v33  ;;  %v2586_v37 = vpack.c.bf16 %v2585_v40, %v2585_v40  ;;  %v2758_v38 = vpack.c.bf16 %v2757_v34, %v2757_v34  ;;  %v2845_v0 = vpack.c.bf16 %v2844_v35, %v2844_v35 }
 0x665   : > { %v2931_v2 = vadd.f32 %v2930_v41, %v2929_v1 }
 0x666   : > { %2684 = vmatmul.bf16.vlgmr.msra.gmra.mxu3 %v2611_v36  ;;  %2745 = vmatmul.bf16.vlgmr.msrb.gmra.mxu1 %v2586_v37 }
 0x667   : > { %2831 = vmatmul.bf16.vlgmr.msra.gmra.mxu2 %v2758_v38  ;;  %2918 = vmatmul.bf16.vlgmr.msra.gmra.mxu0 %v2845_v0  ;;  %v2932_v43 = vpack.c.bf16 %v2931_v2, %v2931_v2 }
 0x676   : > { %3005 = vmatmul.bf16.vlgmr.msrb.gmra.mxu3 %v2932_v43 }
 0x6e3   : > { %v2746_v56 = vpop.f32.mrf.mxu1 }
 0x6e4   : > { %v2919_v58 = vpop.f32.mrf.mxu0 }
 0x6e9   : > { %v2685_v44 = vpop.f32.mrf.mxu3 }
 0x6ea   : > { %v2832_v17 = vpop.f32.mrf.mxu2  ;;  %v2747_v49 = vadd.f32 %v2746_v56, %v2685_v44 }
 0x6eb   : > { %v2748_v26 = vpop.f32.mrf.mxu1 }
 0x6ec   : > { %v2921_v39 = vpop.f32.mrf.mxu0  ;;  %v2836_v61 = vadd.f32 %v2832_v17, %v2747_v49 }
 0x6ee   : > { %v2923_v4 = vadd.f32 %v2919_v58, %v2836_v61 }
 0x6f1   : > { %v2687_v60 = vpop.f32.mrf.mxu3 }
 0x6f2   : > { %v2834_v53 = vpop.f32.mrf.mxu2 }
 0x6f9   : > { %v3006_v5 = vpop.f32.mrf.mxu3 }
 0x6fa   : > { %v3010_v6 = vadd.f32 %v3006_v5, %v2923_v4 }
 0x6fc   : > { %v3012_v7 = vadd.f32 %v3011_v9, %v3010_v6 }
 0x6fe   : > { %v3013_v8 = vmax.f32 %v3012_v7, 0.0 }
 0x700   : > { %v3014_v10 = vpack.c.bf16 %v3013_v8, %v3013_v8 }
 0x701   : > { %v3008_v59 = vpop.f32.mrf.mxu3 }
 0x702   : > { %3088 = vmatmul.bf16.vlgmr.msra.gmra.mxu1 %v3014_v10 }
 0x77f   : > { %v3089_v14 = vpop.f32.mrf.mxu1 }
 0x780   : > { %v3090_v15 = vadd.f32 %v3089_v14, %v3031_v13 }
 0x782   : > { %v3093_v18 = vmax.f32 %v3090_v15, 0.0 }
 0x784   : > { %v3094_v19 = vpack.c.bf16 %v3093_v18, %v3093_v18 }
 0x786   : > { %3168 = vmatmul.bf16.vlgmr.msrb.gmra.mxu2 %v3094_v19 }
 0x787   : > { %v3091_v20 = vpop.f32.mrf.mxu1 }
 0x809   : > { %v3169_v22 = vpop.f32.mrf.mxu2 }
 0x80a   : > { %v3170_v23 = vadd.f32 %v3169_v22, %v3111_v21 }
 0x80c   : > { %3173 = vst [vmem:[%s586_s27] sm:$0x1] %v3170_v23 }
 0x80d   : > { %4861 = shalt.err (!%p4858_p8)
}
 0x80e   : > { %4572 = dma.vmem_to_hbm [thread:$0]  (%p5042_p5), %s3186_s9, 16, %s3188_s21, %s3175_s24  }
 0x811   : > { %v3171_v24 = vpop.f32.mrf.mxu2 }
 0x812 PF: > { %s5911_s30 = sld [smem:[#allocation21_spill]] }
 0x813   : > { %s5912_s16 = sld [smem:[#allocation19_spill]] }
 0x818   : > { %p4609_p9 = scmp.ge.s32.totalorder %s5911_s30, 2 }
 0x819   : > { %s3199_s29 = sand.u32 1, %s5912_s16  }
 0x81a   : > { %p4594_p10 = pnand %p4609_p9, %p5046_p6  ;;  %s3200_s6 = scalar_lea.sflag [#allocation4], %s3199_s29 }
 0x81c   : > { %p4595_p11 = pneg %p4594_p10 }
 0x81e   : > { %4895 = dma.done.wait (%p4595_p11), %s3200_s6, 16  }
 0x81f   : > { %4897 = vsyncadd (%p4595_p11), %s3200_s6, 4294967280  ;;  %s5914_s21 = sld [smem:[#allocation22_spill]]  ;;  %s5917_s18 = smov %s4904_s19 }
 0x820   : > { %s5915_s23 = sld [smem:[#allocation20_spill]] }
 0x821   : > { %s5916_s20 = sld [smem:[#allocation23_spill]] }
 0x825   : > { %p29_p12 = scmp.ge.s32.totalorder %s5914_s21, 4  }
 0x826   : > { %s5918_s19 = smov %s5915_s23 }
 0x827   :  { %31 = sbr.rel (!%p29_p12) target bundleno = 14 (0xe), region = 158 }
 0x82c   :  { %3205 = vsyncpa [#allocation3], 1 }
 0x82d   :  { %3207 = vsyncpa [#allocation3 + $0x1], 1 }
 0x82e   :  { %3208 = vsyncpa [#allocation6], 1 }
 0x82f   :  { %3209 = vsyncpa [#allocation9], 1 }
 0x830   :  { %3210 = vsyncpa [#allocation12], 1 }
 0x831   :  { %3211 = vsyncpa [#allocation4], 1 }
 0x832   :  { %3213 = vsyncpa [#allocation4 + $0x1], 1 }

</bundles_post_ra>
